<compile_context>
chip_gen: v7x
topology: tpu7x:2x2x1
jax: 0.10.0
libtpu: 0.0.40
codegen_flags: <defaults>
</compile_context>

<pallas_src>
import functools
import math

import jax
import jax.numpy as jnp
from jax import lax
from jax.experimental import pallas as pl
from jax.experimental.pallas import tpu as pltpu

# ----------------------------- constants -----------------------------------

EB_FILTERS = (3, 3, 3, 3)          # compressai EntropyBottleneck default filters
EB_INIT_SCALE = 10.0               # compressai default init_scale
SCALE_BOUND = 0.11                 # GaussianConditional default scale lower bound
LIKELIHOOD_BOUND = 1e-9            # likelihood lower bound (both entropy models)
LEAKY_SLOPE = 0.01                 # nn.LeakyReLU default negative_slope
INV_LN2 = 1.0 / math.log(2.0)
INV_SQRT2 = 2.0 ** -0.5
LANE = 128                         # TPU lane width (pad channel dims to this)
MATMUL_DTYPE = jnp.bfloat16        # MXU operand dtype (accumulation stays f32)

# per-EB-layer (f_in, f_out); filters extended = (1, 3, 3, 3, 3, 1)
_EB_SPECS = [(1, 3), (3, 3), (3, 3), (3, 3), (3, 1)]

PACKED_NAMES = (
    ["w_he", "b_he", "medians", "w_mu", "b_mu", "w_std", "b_std"]
    + [f"eb_sp{i}" for i in range(5)]      # softplus(EB matrix), pre-applied
    + [f"eb_b{i}" for i in range(5)]       # EB biases
    + [f"eb_tf{i}" for i in range(4)]      # tanh(EB factor), pre-applied
)


def _round_up(v, m):
    return ((v + m - 1) // m) * m


# ----------------------- elementwise math helpers ---------------------------
# (only exp / log / tanh / floor / where / arithmetic -> guaranteed Mosaic lowering)


def _softplus(x):
    return jnp.maximum(x, 0.0) + jnp.log(1.0 + jnp.exp(-jnp.abs(x)))


def _sigmoid(x):
    # exact divide kept on purpose: the EB likelihood is a difference of two
    # near-equal sigmoids, which amplifies reciprocal approximation error.
    ez = jnp.exp(-jnp.abs(x))
    s = ez / (1.0 + ez)
    return jnp.where(x >= 0.0, 1.0 - s, s)


def _sign(x):
    return jnp.where(x > 0.0, 1.0, jnp.where(x < 0.0, -1.0, 0.0))


def _erf(x, recip):
    # Abramowitz & Stegun 7.1.26
    a1, a2, a3, a4, a5 = 0.254829592, -0.284496736, 1.421413741, -1.453152027, 1.061405429
    p = 0.3275911
    s = _sign(x)
    ax = jnp.abs(x)
    t = recip(1.0 + p * ax)
    poly = ((((a5 * t + a4) * t + a3) * t + a2) * t + a1) * t
    return s * (1.0 - poly * jnp.exp(-ax * ax))


def _std_normal_cdf(v, recip):
    # == 0.5 * erfc(-v / sqrt(2))  (GaussianConditional._standardized_cumulative)
    return 0.5 * (1.0 + _erf(v * INV_SQRT2, recip))


def _leaky_relu(x):
    return jnp.where(x >= 0.0, x, LEAKY_SLOPE * x)


def _round_half_even(x):
    # matches torch.round (banker's rounding) for float32 magnitudes of interest
    f = jnp.floor(x)
    r = x - f
    half_f = f * 0.5
    f_is_odd = (half_f - jnp.floor(half_f)) != 0.0
    round_up = (r > 0.5) | ((r == 0.5) & f_is_odd)
    return jnp.where(round_up, f + 1.0, f)


# ----------------------- HyperPrior forward math ----------------------------


def _logits_cumulative(v, p):
    """EntropyBottleneck._logits_cumulative on channel-last (rows, M_pad) data.

    p['eb_sp{i}'] already holds softplus(matrix) and p['eb_tf{i}'] holds
    tanh(factor) (hoisted, data-independent transcendentals).
    """
    logits = [v]
    for i, (fin, fout) in enumerate(_EB_SPECS):
        sp = p[f"eb_sp{i}"]                 # (fout*fin, M_pad)
        b = p[f"eb_b{i}"]                   # (fout, M_pad)
        tf = p.get(f"eb_tf{i}")             # (fout, M_pad) or None (last layer)
        new = []
        for po in range(fout):
            acc = b[po:po + 1, :] + sp[po * fin:po * fin + 1, :] * logits[0]
            for q in range(1, fin):
                acc = acc + sp[po * fin + q:po * fin + q + 1, :] * logits[q]
            if tf is not None:
                acc = acc + tf[po:po + 1, :] * jnp.tanh(acc)
            new.append(acc)
        logits = new
    return logits[0]                        # (rows, M_pad)


def _hyperprior_tile_math(x, p, row_start, B, N, M, recip):
    """x: (T, N_pad) f32, zero-padded tile of the batch.

    Returns (sum(-ln x_llh), sum(-ln z_llh)) over the valid (row < B, col < N/M)
    entries of this tile.
    """
    T, N_pad = x.shape
    M_pad = p["b_he"].shape[1]

    # validity masks (padded rows / channels contribute nothing to the sums)
    row_n = lax.broadcasted_iota(jnp.int32, (T, N_pad), 0) + row_start
    row_m = lax.broadcasted_iota(jnp.int32, (T, M_pad), 0) + row_start
    mask_x = (row_n < B) & (lax.broadcasted_iota(jnp.int32, (T, N_pad), 1) < N)
    mask_z = (row_m < B) & (lax.broadcasted_iota(jnp.int32, (T, M_pad), 1) < M)

    # hyper_encoder: Linear(N, M)  (bf16 MXU operands, f32 accumulation)
    z = jnp.dot(x.astype(MATMUL_DTYPE), p["w_he"],
                preferred_element_type=jnp.float32) + p["b_he"]

    # EntropyBottleneck (eval): z_hat = round(z - median) + median
    med = p["medians"]
    z_hat = _round_half_even(z - med) + med

    # single stacked pass through the EB logits chain for lower AND upper
    v = jnp.concatenate([z_hat - 0.5, z_hat + 0.5], axis=0)      # (2T, M_pad)
    lg = _logits_cumulative(v, p)
    lower, upper = lg[:T], lg[T:]
    sgn = -_sign(lower + upper)
    z_llh = jnp.abs(_sigmoid(sgn * upper) - _sigmoid(sgn * lower))
    z_llh = jnp.maximum(z_llh, LIKELIHOOD_BOUND)

    # mean / std heads: Linear(M, N) + LeakyReLU
    zb = z_hat.astype(MATMUL_DTYPE)
    mu = _leaky_relu(jnp.dot(zb, p["w_mu"],
                             preferred_element_type=jnp.float32) + p["b_mu"])
    sigma = _leaky_relu(jnp.dot(zb, p["w_std"],
                                preferred_element_type=jnp.float32) + p["b_std"])

    # GaussianConditional likelihood (x_hat is unused by the module output)
    values = jnp.abs(x - mu)
    inv_scales = recip(jnp.maximum(sigma, SCALE_BOUND))          # computed once, reused
    g_up = _std_normal_cdf((0.5 - values) * inv_scales, recip)
    g_lo = _std_normal_cdf((-0.5 - values) * inv_scales, recip)
    x_llh = jnp.maximum(g_up - g_lo, LIKELIHOOD_BOUND)

    sx = jnp.sum(jnp.where(mask_x, -jnp.log(x_llh), 0.0))
    sz = jnp.sum(jnp.where(mask_z, -jnp.log(z_llh), 0.0))
    return sx, sz


# ------------------------------ Pallas kernel -------------------------------


def _make_kernel(B, N, M, TB):
    def kernel(x_ref, *refs):
        param_refs = refs[:-1]
        out_ref = refs[-1]                                  # (1, 8, 128) VMEM block
        p = {name: r[...] for name, r in zip(PACKED_NAMES, param_refs)}
        recip = lambda t: pl.reciprocal(t, approx=True)     # EUP vrcp
        row_start = pl.program_id(0) * TB
        sx, sz = _hyperprior_tile_math(x_ref[...], p, row_start, B, N, M, recip)
        # lane-dense full-tile store of the two partial sums (no masked vst)
        sub = lax.broadcasted_iota(jnp.int32, (1, 8, 128), 1)
        lane = lax.broadcasted_iota(jnp.int32, (1, 8, 128), 2)
        out_ref[...] = jnp.where((sub == 0) & (lane == 0), sx,
                                 jnp.where((sub == 0) & (lane == 1), sz, 0.0))
    return kernel


def hyperprior_forward(x_nchw, packed, N, M):
    """x_nchw: (B, N, 1, 1) float32 (PyTorch NCHW convention). Returns scalar rate."""
    B, n_in, H, W = x_nchw.shape
    assert n_in == N and H == 1 and W == 1, "HyperPrior forward implies (B, N, 1, 1)"
    N_pad, M_pad = packed["w_he"].shape

    # batch tile: multiple of 8 sublanes, capped at 128 rows per step.
    # For tiny B this degenerates to a single grid step (no per-step overhead).
    TB = min(128, _round_up(B, 8))
    B_pad = _round_up(B, TB)
    num_tiles = B_pad // TB

    x2d = x_nchw.reshape(B, N).astype(jnp.float32)
    x_pad = jnp.zeros((B_pad, N_pad), jnp.float32).at[:B, :N].set(x2d)

    in_specs = [pl.BlockSpec((TB, N_pad), lambda i: (i, 0))]       # batch-tiled input
    for name in PACKED_NAMES:                                      # resident parameters
        in_specs.append(pl.BlockSpec(packed[name].shape, lambda i: (0, 0)))

    partials = pl.pallas_call(
        _make_kernel(B, N, M, TB),
        out_shape=jax.ShapeDtypeStruct((num_tiles, 8, 128), jnp.float32),
        grid=(num_tiles,),
        in_specs=in_specs,
        out_specs=pl.BlockSpec((1, 8, 128), lambda i: (i, 0, 0)),
        compiler_params=pltpu.CompilerParams(
            dimension_semantics=("parallel",),          # shard tiles across TCs (v7x)
            vmem_limit_bytes=48 * 1024 * 1024,          # explicit cap, v7x-safe
        ),
    )(x_pad, *[packed[name] for name in PACKED_NAMES])

    sx = jnp.sum(partials[:, 0, 0])
    sz = jnp.sum(partials[:, 0, 1])
    return (sx / (B * N) + sz / (B * M)) * INV_LN2


def hyperprior_reference(x_nchw, packed, N, M):
    """Pure-JAX reference (same math, exact divisions instead of approx recip)."""
    B = x_nchw.shape[0]
    N_pad, M_pad = packed["w_he"].shape
    x2d = x_nchw.reshape(B, N).astype(jnp.float32)
    x_pad = jnp.zeros((B, N_pad), jnp.float32).at[:, :N].set(x2d)
    sx, sz = _hyperprior_tile_math(x_pad, dict(packed), 0, B, N, M, lambda t: 1.0 / t)
    return (sx / (B * N) + sz / (B * M)) * INV_LN2


# ------------------------- parameter init & packing -------------------------


def init_raw_params(key, N, M):
    """Deterministic init in logical (unpadded) shapes, matching the torch module."""
    ks = jax.random.split(key, 7)
    p = {}
    p["w_he"] = jax.random.normal(ks[0], (N, M), jnp.float32) / math.sqrt(N)
    p["b_he"] = jax.random.normal(ks[1], (1, M), jnp.float32) * 0.1
    p["w_mu"] = jax.random.normal(ks[2], (M, N), jnp.float32) / math.sqrt(M)
    p["b_mu"] = jax.random.normal(ks[3], (1, N), jnp.float32) * 0.1
    p["w_std"] = jax.random.normal(ks[4], (M, N), jnp.float32) / math.sqrt(M)
    p["b_std"] = jax.random.normal(ks[5], (1, N), jnp.float32) * 0.1

    # EntropyBottleneck(M) parameters, compressai initialization
    filters = (1,) + EB_FILTERS + (1,)
    scale = EB_INIT_SCALE ** (1.0 / (len(EB_FILTERS) + 1))
    bkeys = jax.random.split(ks[6], len(EB_FILTERS) + 1)
    for i in range(len(EB_FILTERS) + 1):
        fin, fout = filters[i], filters[i + 1]
        init = math.log(math.expm1(1.0 / scale / fout))
        mat = jnp.full((M, fout, fin), init, jnp.float32)            # torch layout (C, fout, fin)
        p[f"eb_m{i}"] = jnp.transpose(mat, (1, 2, 0)).reshape(fout * fin, M)
        bias = jax.random.uniform(bkeys[i], (M, fout, 1), jnp.float32, -0.5, 0.5)
        p[f"eb_b{i}"] = bias[:, :, 0].T                              # (fout, M)
        if i < len(EB_FILTERS):
            p[f"eb_f{i}"] = jnp.zeros((fout, M), jnp.float32)
    # quantiles init = [-init_scale, 0, init_scale] per channel -> medians = 0
    quantiles = jnp.tile(jnp.array([[[-EB_INIT_SCALE, 0.0, EB_INIT_SCALE]]],
                                   jnp.float32), (M, 1, 1))
    p["medians"] = quantiles[:, 0, 1].reshape(1, M)
    return p


def pack_params(raw, N, M):
    """Zero-pad channels to multiples of 128, pre-apply softplus/tanh on EB params,
    and cast the MXU weight operands to bf16."""
    N_pad, M_pad = _round_up(N, LANE), _round_up(M, LANE)

    def pad2(a, r, c):
        return jnp.zeros((r, c), a.dtype).at[:a.shape[0], :a.shape[1]].set(a)

    p = {}
    p["w_he"] = pad2(raw["w_he"], N_pad, M_pad).astype(MATMUL_DTYPE)
    p["b_he"] = pad2(raw["b_he"], 1, M_pad)
    p["medians"] = pad2(raw["medians"], 1, M_pad)
    p["w_mu"] = pad2(raw["w_mu"], M_pad, N_pad).astype(MATMUL_DTYPE)
    p["b_mu"] = pad2(raw["b_mu"], 1, N_pad)
    p["w_std"] = pad2(raw["w_std"], M_pad, N_pad).astype(MATMUL_DTYPE)
    p["b_std"] = pad2(raw["b_std"], 1, N_pad)
    for i, (fin, fout) in enumerate(_EB_SPECS):
        p[f"eb_sp{i}"] = pad2(_softplus(raw[f"eb_m{i}"]), fout * fin, M_pad)
        p[f"eb_b{i}"] = pad2(raw[f"eb_b{i}"], fout, M_pad)
        if i < len(_EB_SPECS) - 1:
            p[f"eb_tf{i}"] = pad2(jnp.tanh(raw[f"eb_f{i}"]), fout, M_pad)
    return p


# ------------------------------------ main ----------------------------------

if __name__ == "__main__":
    B, N, M = 2, 8, 16
    key = jax.random.PRNGKey(0)
    kx, kp = jax.random.split(key)

    x = jax.random.normal(kx, (B, N, 1, 1), jnp.float32)   # NCHW, 1x1 spatial
    raw = init_raw_params(kp, N, M)
    packed = pack_params(raw, N, M)

    rate_fn = jax.jit(functools.partial(hyperprior_forward, N=N, M=M))
    rate = jax.block_until_ready(rate_fn(x, packed))

    # sanity: same math (same bf16 matmuls / hoisted params) with exact divisions
    ref = hyperprior_reference(x, packed, N, M)
    assert bool(jnp.isfinite(rate)), rate
    assert bool(jnp.allclose(rate, ref, rtol=2e-2, atol=2e-2)), (float(rate), float(ref))

    print("KERNEL_OK")
</pallas_src>

<mosaic_0001>
module attributes {stable_mosaic.version = 11 : i64} {
  func.func @kernel(%arg0: i32, %arg1: memref<8x128xf32, #tpu.memory_space<vmem>>, %arg2: memref<128x128xbf16, #tpu.memory_space<vmem>>, %arg3: memref<1x128xf32, #tpu.memory_space<vmem>>, %arg4: memref<1x128xf32, #tpu.memory_space<vmem>>, %arg5: memref<128x128xbf16, #tpu.memory_space<vmem>>, %arg6: memref<1x128xf32, #tpu.memory_space<vmem>>, %arg7: memref<128x128xbf16, #tpu.memory_space<vmem>>, %arg8: memref<1x128xf32, #tpu.memory_space<vmem>>, %arg9: memref<3x128xf32, #tpu.memory_space<vmem>>, %arg10: memref<9x128xf32, #tpu.memory_space<vmem>>, %arg11: memref<9x128xf32, #tpu.memory_space<vmem>>, %arg12: memref<9x128xf32, #tpu.memory_space<vmem>>, %arg13: memref<3x128xf32, #tpu.memory_space<vmem>>, %arg14: memref<3x128xf32, #tpu.memory_space<vmem>>, %arg15: memref<3x128xf32, #tpu.memory_space<vmem>>, %arg16: memref<3x128xf32, #tpu.memory_space<vmem>>, %arg17: memref<3x128xf32, #tpu.memory_space<vmem>>, %arg18: memref<1x128xf32, #tpu.memory_space<vmem>>, %arg19: memref<3x128xf32, #tpu.memory_space<vmem>>, %arg20: memref<3x128xf32, #tpu.memory_space<vmem>>, %arg21: memref<3x128xf32, #tpu.memory_space<vmem>>, %arg22: memref<3x128xf32, #tpu.memory_space<vmem>>, %arg23: memref<1x8x128xf32, #tpu.memory_space<vmem>>) attributes {dimension_semantics = [#tpu.dimension_semantics<parallel>], iteration_bounds = array<i64: 1>, scalar_prefetch = 0 : i64, scratch_operands = 0 : i64, tpu.core_type = #tpu.core_type<tc>, window_params = [{transform_indices = @transform_0, window_bounds = array<i64: 8, 128>}, {pipeline_mode = #tpu.pipeline_mode<synchronous>, transform_indices = @transform_1, window_bounds = array<i64: 128, 128>}, {pipeline_mode = #tpu.pipeline_mode<synchronous>, transform_indices = @transform_2, window_bounds = array<i64: 1, 128>}, {pipeline_mode = #tpu.pipeline_mode<synchronous>, transform_indices = @transform_3, window_bounds = array<i64: 1, 128>}, {pipeline_mode = #tpu.pipeline_mode<synchronous>, transform_indices = @transform_4, window_bounds = array<i64: 128, 128>}, {pipeline_mode = #tpu.pipeline_mode<synchronous>, transform_indices = @transform_5, window_bounds = array<i64: 1, 128>}, {pipeline_mode = #tpu.pipeline_mode<synchronous>, transform_indices = @transform_6, window_bounds = array<i64: 128, 128>}, {pipeline_mode = #tpu.pipeline_mode<synchronous>, transform_indices = @transform_7, window_bounds = array<i64: 1, 128>}, {pipeline_mode = #tpu.pipeline_mode<synchronous>, transform_indices = @transform_8, window_bounds = array<i64: 3, 128>}, {pipeline_mode = #tpu.pipeline_mode<synchronous>, transform_indices = @transform_9, window_bounds = array<i64: 9, 128>}, {pipeline_mode = #tpu.pipeline_mode<synchronous>, transform_indices = @transform_10, window_bounds = array<i64: 9, 128>}, {pipeline_mode = #tpu.pipeline_mode<synchronous>, transform_indices = @transform_11, window_bounds = array<i64: 9, 128>}, {pipeline_mode = #tpu.pipeline_mode<synchronous>, transform_indices = @transform_12, window_bounds = array<i64: 3, 128>}, {pipeline_mode = #tpu.pipeline_mode<synchronous>, transform_indices = @transform_13, window_bounds = array<i64: 3, 128>}, {pipeline_mode = #tpu.pipeline_mode<synchronous>, transform_indices = @transform_14, window_bounds = array<i64: 3, 128>}, {pipeline_mode = #tpu.pipeline_mode<synchronous>, transform_indices = @transform_15, window_bounds = array<i64: 3, 128>}, {pipeline_mode = #tpu.pipeline_mode<synchronous>, transform_indices = @transform_16, window_bounds = array<i64: 3, 128>}, {pipeline_mode = #tpu.pipeline_mode<synchronous>, transform_indices = @transform_17, window_bounds = array<i64: 1, 128>}, {pipeline_mode = #tpu.pipeline_mode<synchronous>, transform_indices = @transform_18, window_bounds = array<i64: 3, 128>}, {pipeline_mode = #tpu.pipeline_mode<synchronous>, transform_indices = @transform_19, window_bounds = array<i64: 3, 128>}, {pipeline_mode = #tpu.pipeline_mode<synchronous>, transform_indices = @transform_20, window_bounds = array<i64: 3, 128>}, {pipeline_mode = #tpu.pipeline_mode<synchronous>, transform_indices = @transform_21, window_bounds = array<i64: 3, 128>}, {transform_indices = @transform_22, window_bounds = array<i64: 1, 8, 128>}]} {
    %c0 = arith.constant 0 : index
    %c0_0 = arith.constant 0 : index
    %0 = vector.load %arg2[%c0, %c0_0] : memref<128x128xbf16, #tpu.memory_space<vmem>>, vector<128x128xbf16>
    %c0_1 = arith.constant 0 : index
    %c0_2 = arith.constant 0 : index
    %1 = vector.load %arg3[%c0_1, %c0_2] : memref<1x128xf32, #tpu.memory_space<vmem>>, vector<1x128xf32>
    %c0_3 = arith.constant 0 : index
    %c0_4 = arith.constant 0 : index
    %2 = vector.load %arg4[%c0_3, %c0_4] : memref<1x128xf32, #tpu.memory_space<vmem>>, vector<1x128xf32>
    %c0_5 = arith.constant 0 : index
    %c0_6 = arith.constant 0 : index
    %3 = vector.load %arg5[%c0_5, %c0_6] : memref<128x128xbf16, #tpu.memory_space<vmem>>, vector<128x128xbf16>
    %c0_7 = arith.constant 0 : index
    %c0_8 = arith.constant 0 : index
    %4 = vector.load %arg6[%c0_7, %c0_8] : memref<1x128xf32, #tpu.memory_space<vmem>>, vector<1x128xf32>
    %c0_9 = arith.constant 0 : index
    %c0_10 = arith.constant 0 : index
    %5 = vector.load %arg7[%c0_9, %c0_10] : memref<128x128xbf16, #tpu.memory_space<vmem>>, vector<128x128xbf16>
    %c0_11 = arith.constant 0 : index
    %c0_12 = arith.constant 0 : index
    %6 = vector.load %arg8[%c0_11, %c0_12] : memref<1x128xf32, #tpu.memory_space<vmem>>, vector<1x128xf32>
    %c0_13 = arith.constant 0 : index
    %c0_14 = arith.constant 0 : index
    %7 = vector.load %arg9[%c0_13, %c0_14] : memref<3x128xf32, #tpu.memory_space<vmem>>, vector<3x128xf32>
    %c0_15 = arith.constant 0 : index
    %c0_16 = arith.constant 0 : index
    %8 = vector.load %arg10[%c0_15, %c0_16] : memref<9x128xf32, #tpu.memory_space<vmem>>, vector<9x128xf32>
    %c0_17 = arith.constant 0 : index
    %c0_18 = arith.constant 0 : index
    %9 = vector.load %arg11[%c0_17, %c0_18] : memref<9x128xf32, #tpu.memory_space<vmem>>, vector<9x128xf32>
    %c0_19 = arith.constant 0 : index
    %c0_20 = arith.constant 0 : index
    %10 = vector.load %arg12[%c0_19, %c0_20] : memref<9x128xf32, #tpu.memory_space<vmem>>, vector<9x128xf32>
    %c0_21 = arith.constant 0 : index
    %c0_22 = arith.constant 0 : index
    %11 = vector.load %arg13[%c0_21, %c0_22] : memref<3x128xf32, #tpu.memory_space<vmem>>, vector<3x128xf32>
    %c0_23 = arith.constant 0 : index
    %c0_24 = arith.constant 0 : index
    %12 = vector.load %arg14[%c0_23, %c0_24] : memref<3x128xf32, #tpu.memory_space<vmem>>, vector<3x128xf32>
    %c0_25 = arith.constant 0 : index
    %c0_26 = arith.constant 0 : index
    %13 = vector.load %arg15[%c0_25, %c0_26] : memref<3x128xf32, #tpu.memory_space<vmem>>, vector<3x128xf32>
    %c0_27 = arith.constant 0 : index
    %c0_28 = arith.constant 0 : index
    %14 = vector.load %arg16[%c0_27, %c0_28] : memref<3x128xf32, #tpu.memory_space<vmem>>, vector<3x128xf32>
    %c0_29 = arith.constant 0 : index
    %c0_30 = arith.constant 0 : index
    %15 = vector.load %arg17[%c0_29, %c0_30] : memref<3x128xf32, #tpu.memory_space<vmem>>, vector<3x128xf32>
    %c0_31 = arith.constant 0 : index
    %c0_32 = arith.constant 0 : index
    %16 = vector.load %arg18[%c0_31, %c0_32] : memref<1x128xf32, #tpu.memory_space<vmem>>, vector<1x128xf32>
    %c0_33 = arith.constant 0 : index
    %c0_34 = arith.constant 0 : index
    %17 = vector.load %arg19[%c0_33, %c0_34] : memref<3x128xf32, #tpu.memory_space<vmem>>, vector<3x128xf32>
    %c0_35 = arith.constant 0 : index
    %c0_36 = arith.constant 0 : index
    %18 = vector.load %arg20[%c0_35, %c0_36] : memref<3x128xf32, #tpu.memory_space<vmem>>, vector<3x128xf32>
    %c0_37 = arith.constant 0 : index
    %c0_38 = arith.constant 0 : index
    %19 = vector.load %arg21[%c0_37, %c0_38] : memref<3x128xf32, #tpu.memory_space<vmem>>, vector<3x128xf32>
    %c0_39 = arith.constant 0 : index
    %c0_40 = arith.constant 0 : index
    %20 = vector.load %arg22[%c0_39, %c0_40] : memref<3x128xf32, #tpu.memory_space<vmem>>, vector<3x128xf32>
    %c8_i32 = arith.constant 8 : i32
    %21 = arith.muli %arg0, %c8_i32 : i32
    %c0_41 = arith.constant 0 : index
    %c0_42 = arith.constant 0 : index
    %22 = vector.load %arg1[%c0_41, %c0_42] : memref<8x128xf32, #tpu.memory_space<vmem>>, vector<8x128xf32>
    %23 = tpu.iota {dimensions = array<i32: 0>} : vector<8x128xi32>
    %24 = vector.broadcast %21 : i32 to vector<8x128xi32>
    %25 = arith.addi %23, %24 : vector<8x128xi32>
    %26 = tpu.iota {dimensions = array<i32: 0>} : vector<8x128xi32>
    %27 = vector.broadcast %21 : i32 to vector<8x128xi32>
    %28 = arith.addi %26, %27 : vector<8x128xi32>
    %c2_i32 = arith.constant 2 : i32
    %29 = vector.broadcast %c2_i32 : i32 to vector<8x128xi32>
    %30 = arith.cmpi slt, %25, %29 : vector<8x128xi32>
    %31 = tpu.iota {dimensions = array<i32: 1>} : vector<8x128xi32>
    %c8_i32_43 = arith.constant 8 : i32
    %32 = vector.broadcast %c8_i32_43 : i32 to vector<8x128xi32>
    %33 = arith.cmpi slt, %31, %32 : vector<8x128xi32>
    %34 = arith.andi %30, %33 : vector<8x128xi1>
    %c2_i32_44 = arith.constant 2 : i32
    %35 = vector.broadcast %c2_i32_44 : i32 to vector<8x128xi32>
    %36 = arith.cmpi slt, %28, %35 : vector<8x128xi32>
    %37 = tpu.iota {dimensions = array<i32: 1>} : vector<8x128xi32>
    %c16_i32 = arith.constant 16 : i32
    %38 = vector.broadcast %c16_i32 : i32 to vector<8x128xi32>
    %39 = arith.cmpi slt, %37, %38 : vector<8x128xi32>
    %40 = arith.andi %36, %39 : vector<8x128xi1>
    %41 = arith.truncf %22 : vector<8x128xf32> to vector<8x128xbf16>
    %cst = arith.constant dense<0.000000e+00> : vector<8x128xf32>
    %42 = tpu.matmul %41, %0, %cst {dimension_numbers = #tpu.dot_dimension_numbers<[1], [0], [0], [1], [0, 0, 1, 1], [], []>} : vector<8x128xbf16>, vector<128x128xbf16>, vector<8x128xf32> -> vector<8x128xf32>
    %43 = vector.broadcast %1 : vector<1x128xf32> to vector<8x128xf32>
    %44 = arith.addf %42, %43 : vector<8x128xf32>
    %45 = vector.broadcast %2 : vector<1x128xf32> to vector<8x128xf32>
    %46 = arith.subf %44, %45 : vector<8x128xf32>
    %47 = math.floor %46 : vector<8x128xf32>
    %48 = arith.subf %46, %47 : vector<8x128xf32>
    %cst_45 = arith.constant 5.000000e-01 : f32
    %49 = vector.broadcast %cst_45 : f32 to vector<8x128xf32>
    %50 = arith.mulf %47, %49 : vector<8x128xf32>
    %51 = math.floor %50 : vector<8x128xf32>
    %52 = arith.subf %50, %51 : vector<8x128xf32>
    %cst_46 = arith.constant 0.000000e+00 : f32
    %53 = vector.broadcast %cst_46 : f32 to vector<8x128xf32>
    %54 = arith.cmpf one, %52, %53 : vector<8x128xf32>
    %cst_47 = arith.constant 5.000000e-01 : f32
    %55 = vector.broadcast %cst_47 : f32 to vector<8x128xf32>
    %56 = arith.cmpf ogt, %48, %55 : vector<8x128xf32>
    %cst_48 = arith.constant 5.000000e-01 : f32
    %57 = vector.broadcast %cst_48 : f32 to vector<8x128xf32>
    %58 = arith.cmpf oeq, %48, %57 : vector<8x128xf32>
    %59 = arith.andi %58, %54 : vector<8x128xi1>
    %60 = arith.ori %56, %59 : vector<8x128xi1>
    %cst_49 = arith.constant 1.000000e+00 : f32
    %61 = vector.broadcast %cst_49 : f32 to vector<8x128xf32>
    %62 = arith.addf %47, %61 : vector<8x128xf32>
    %63 = arith.select %60, %62, %47 : vector<8x128xi1>, vector<8x128xf32>
    %64 = vector.broadcast %2 : vector<1x128xf32> to vector<8x128xf32>
    %65 = arith.addf %63, %64 : vector<8x128xf32>
    %cst_50 = arith.constant 5.000000e-01 : f32
    %66 = vector.broadcast %cst_50 : f32 to vector<8x128xf32>
    %67 = arith.subf %65, %66 : vector<8x128xf32>
    %cst_51 = arith.constant 5.000000e-01 : f32
    %68 = vector.broadcast %cst_51 : f32 to vector<8x128xf32>
    %69 = arith.addf %65, %68 : vector<8x128xf32>
    %70 = tpu.concatenate %67, %69 in 0 : vector<8x128xf32>, vector<8x128xf32> -> vector<16x128xf32>
    %71 = vector.extract_strided_slice %12 {offsets = [0, 0], sizes = [1, 128], strides = [1, 1]} : vector<3x128xf32> to vector<1x128xf32>
    %72 = vector.extract_strided_slice %7 {offsets = [0, 0], sizes = [1, 128], strides = [1, 1]} : vector<3x128xf32> to vector<1x128xf32>
    %73 = vector.broadcast %72 : vector<1x128xf32> to vector<16x128xf32>
    %74 = arith.mulf %73, %70 : vector<16x128xf32>
    %75 = vector.broadcast %71 : vector<1x128xf32> to vector<16x128xf32>
    %76 = arith.addf %75, %74 : vector<16x128xf32>
    %77 = vector.extract_strided_slice %17 {offsets = [0, 0], sizes = [1, 128], strides = [1, 1]} : vector<3x128xf32> to vector<1x128xf32>
    %78 = math.tanh %76 : vector<16x128xf32>
    %79 = vector.broadcast %77 : vector<1x128xf32> to vector<16x128xf32>
    %80 = arith.mulf %79, %78 : vector<16x128xf32>
    %81 = arith.addf %76, %80 : vector<16x128xf32>
    %82 = vector.extract_strided_slice %12 {offsets = [1, 0], sizes = [1, 128], strides = [1, 1]} : vector<3x128xf32> to vector<1x128xf32>
    %83 = vector.extract_strided_slice %7 {offsets = [1, 0], sizes = [1, 128], strides = [1, 1]} : vector<3x128xf32> to vector<1x128xf32>
    %84 = vector.broadcast %83 : vector<1x128xf32> to vector<16x128xf32>
    %85 = arith.mulf %84, %70 : vector<16x128xf32>
    %86 = vector.broadcast %82 : vector<1x128xf32> to vector<16x128xf32>
    %87 = arith.addf %86, %85 : vector<16x128xf32>
    %88 = vector.extract_strided_slice %17 {offsets = [1, 0], sizes = [1, 128], strides = [1, 1]} : vector<3x128xf32> to vector<1x128xf32>
    %89 = math.tanh %87 : vector<16x128xf32>
    %90 = vector.broadcast %88 : vector<1x128xf32> to vector<16x128xf32>
    %91 = arith.mulf %90, %89 : vector<16x128xf32>
    %92 = arith.addf %87, %91 : vector<16x128xf32>
    %93 = vector.extract_strided_slice %12 {offsets = [2, 0], sizes = [1, 128], strides = [1, 1]} : vector<3x128xf32> to vector<1x128xf32>
    %94 = vector.extract_strided_slice %7 {offsets = [2, 0], sizes = [1, 128], strides = [1, 1]} : vector<3x128xf32> to vector<1x128xf32>
    %95 = vector.broadcast %94 : vector<1x128xf32> to vector<16x128xf32>
    %96 = arith.mulf %95, %70 : vector<16x128xf32>
    %97 = vector.broadcast %93 : vector<1x128xf32> to vector<16x128xf32>
    %98 = arith.addf %97, %96 : vector<16x128xf32>
    %99 = vector.extract_strided_slice %17 {offsets = [2, 0], sizes = [1, 128], strides = [1, 1]} : vector<3x128xf32> to vector<1x128xf32>
    %100 = math.tanh %98 : vector<16x128xf32>
    %101 = vector.broadcast %99 : vector<1x128xf32> to vector<16x128xf32>
    %102 = arith.mulf %101, %100 : vector<16x128xf32>
    %103 = arith.addf %98, %102 : vector<16x128xf32>
    %104 = vector.extract_strided_slice %13 {offsets = [0, 0], sizes = [1, 128], strides = [1, 1]} : vector<3x128xf32> to vector<1x128xf32>
    %105 = vector.extract_strided_slice %8 {offsets = [0, 0], sizes = [1, 128], strides = [1, 1]} : vector<9x128xf32> to vector<1x128xf32>
    %106 = vector.broadcast %105 : vector<1x128xf32> to vector<16x128xf32>
    %107 = arith.mulf %106, %81 : vector<16x128xf32>
    %108 = vector.broadcast %104 : vector<1x128xf32> to vector<16x128xf32>
    %109 = arith.addf %108, %107 : vector<16x128xf32>
    %110 = vector.extract_strided_slice %8 {offsets = [1, 0], sizes = [1, 128], strides = [1, 1]} : vector<9x128xf32> to vector<1x128xf32>
    %111 = vector.broadcast %110 : vector<1x128xf32> to vector<16x128xf32>
    %112 = arith.mulf %111, %92 : vector<16x128xf32>
    %113 = arith.addf %109, %112 : vector<16x128xf32>
    %114 = vector.extract_strided_slice %8 {offsets = [2, 0], sizes = [1, 128], strides = [1, 1]} : vector<9x128xf32> to vector<1x128xf32>
    %115 = vector.broadcast %114 : vector<1x128xf32> to vector<16x128xf32>
    %116 = arith.mulf %115, %103 : vector<16x128xf32>
    %117 = arith.addf %113, %116 : vector<16x128xf32>
    %118 = vector.extract_strided_slice %18 {offsets = [0, 0], sizes = [1, 128], strides = [1, 1]} : vector<3x128xf32> to vector<1x128xf32>
    %119 = math.tanh %117 : vector<16x128xf32>
    %120 = vector.broadcast %118 : vector<1x128xf32> to vector<16x128xf32>
    %121 = arith.mulf %120, %119 : vector<16x128xf32>
    %122 = arith.addf %117, %121 : vector<16x128xf32>
    %123 = vector.extract_strided_slice %13 {offsets = [1, 0], sizes = [1, 128], strides = [1, 1]} : vector<3x128xf32> to vector<1x128xf32>
    %124 = vector.extract_strided_slice %8 {offsets = [3, 0], sizes = [1, 128], strides = [1, 1]} : vector<9x128xf32> to vector<1x128xf32>
    %125 = vector.broadcast %124 : vector<1x128xf32> to vector<16x128xf32>
    %126 = arith.mulf %125, %81 : vector<16x128xf32>
    %127 = vector.broadcast %123 : vector<1x128xf32> to vector<16x128xf32>
    %128 = arith.addf %127, %126 : vector<16x128xf32>
    %129 = vector.extract_strided_slice %8 {offsets = [4, 0], sizes = [1, 128], strides = [1, 1]} : vector<9x128xf32> to vector<1x128xf32>
    %130 = vector.broadcast %129 : vector<1x128xf32> to vector<16x128xf32>
    %131 = arith.mulf %130, %92 : vector<16x128xf32>
    %132 = arith.addf %128, %131 : vector<16x128xf32>
    %133 = vector.extract_strided_slice %8 {offsets = [5, 0], sizes = [1, 128], strides = [1, 1]} : vector<9x128xf32> to vector<1x128xf32>
    %134 = vector.broadcast %133 : vector<1x128xf32> to vector<16x128xf32>
    %135 = arith.mulf %134, %103 : vector<16x128xf32>
    %136 = arith.addf %132, %135 : vector<16x128xf32>
    %137 = vector.extract_strided_slice %18 {offsets = [1, 0], sizes = [1, 128], strides = [1, 1]} : vector<3x128xf32> to vector<1x128xf32>
    %138 = math.tanh %136 : vector<16x128xf32>
    %139 = vector.broadcast %137 : vector<1x128xf32> to vector<16x128xf32>
    %140 = arith.mulf %139, %138 : vector<16x128xf32>
    %141 = arith.addf %136, %140 : vector<16x128xf32>
    %142 = vector.extract_strided_slice %13 {offsets = [2, 0], sizes = [1, 128], strides = [1, 1]} : vector<3x128xf32> to vector<1x128xf32>
    %143 = vector.extract_strided_slice %8 {offsets = [6, 0], sizes = [1, 128], strides = [1, 1]} : vector<9x128xf32> to vector<1x128xf32>
    %144 = vector.broadcast %143 : vector<1x128xf32> to vector<16x128xf32>
    %145 = arith.mulf %144, %81 : vector<16x128xf32>
    %146 = vector.broadcast %142 : vector<1x128xf32> to vector<16x128xf32>
    %147 = arith.addf %146, %145 : vector<16x128xf32>
    %148 = vector.extract_strided_slice %8 {offsets = [7, 0], sizes = [1, 128], strides = [1, 1]} : vector<9x128xf32> to vector<1x128xf32>
    %149 = vector.broadcast %148 : vector<1x128xf32> to vector<16x128xf32>
    %150 = arith.mulf %149, %92 : vector<16x128xf32>
    %151 = arith.addf %147, %150 : vector<16x128xf32>
    %152 = vector.extract_strided_slice %8 {offsets = [8, 0], sizes = [1, 128], strides = [1, 1]} : vector<9x128xf32> to vector<1x128xf32>
    %153 = vector.broadcast %152 : vector<1x128xf32> to vector<16x128xf32>
    %154 = arith.mulf %153, %103 : vector<16x128xf32>
    %155 = arith.addf %151, %154 : vector<16x128xf32>
    %156 = vector.extract_strided_slice %18 {offsets = [2, 0], sizes = [1, 128], strides = [1, 1]} : vector<3x128xf32> to vector<1x128xf32>
    %157 = math.tanh %155 : vector<16x128xf32>
    %158 = vector.broadcast %156 : vector<1x128xf32> to vector<16x128xf32>
    %159 = arith.mulf %158, %157 : vector<16x128xf32>
    %160 = arith.addf %155, %159 : vector<16x128xf32>
    %161 = vector.extract_strided_slice %14 {offsets = [0, 0], sizes = [1, 128], strides = [1, 1]} : vector<3x128xf32> to vector<1x128xf32>
    %162 = vector.extract_strided_slice %9 {offsets = [0, 0], sizes = [1, 128], strides = [1, 1]} : vector<9x128xf32> to vector<1x128xf32>
    %163 = vector.broadcast %162 : vector<1x128xf32> to vector<16x128xf32>
    %164 = arith.mulf %163, %122 : vector<16x128xf32>
    %165 = vector.broadcast %161 : vector<1x128xf32> to vector<16x128xf32>
    %166 = arith.addf %165, %164 : vector<16x128xf32>
    %167 = vector.extract_strided_slice %9 {offsets = [1, 0], sizes = [1, 128], strides = [1, 1]} : vector<9x128xf32> to vector<1x128xf32>
    %168 = vector.broadcast %167 : vector<1x128xf32> to vector<16x128xf32>
    %169 = arith.mulf %168, %141 : vector<16x128xf32>
    %170 = arith.addf %166, %169 : vector<16x128xf32>
    %171 = vector.extract_strided_slice %9 {offsets = [2, 0], sizes = [1, 128], strides = [1, 1]} : vector<9x128xf32> to vector<1x128xf32>
    %172 = vector.broadcast %171 : vector<1x128xf32> to vector<16x128xf32>
    %173 = arith.mulf %172, %160 : vector<16x128xf32>
    %174 = arith.addf %170, %173 : vector<16x128xf32>
    %175 = vector.extract_strided_slice %19 {offsets = [0, 0], sizes = [1, 128], strides = [1, 1]} : vector<3x128xf32> to vector<1x128xf32>
    %176 = math.tanh %174 : vector<16x128xf32>
    %177 = vector.broadcast %175 : vector<1x128xf32> to vector<16x128xf32>
    %178 = arith.mulf %177, %176 : vector<16x128xf32>
    %179 = arith.addf %174, %178 : vector<16x128xf32>
    %180 = vector.extract_strided_slice %14 {offsets = [1, 0], sizes = [1, 128], strides = [1, 1]} : vector<3x128xf32> to vector<1x128xf32>
    %181 = vector.extract_strided_slice %9 {offsets = [3, 0], sizes = [1, 128], strides = [1, 1]} : vector<9x128xf32> to vector<1x128xf32>
    %182 = vector.broadcast %181 : vector<1x128xf32> to vector<16x128xf32>
    %183 = arith.mulf %182, %122 : vector<16x128xf32>
    %184 = vector.broadcast %180 : vector<1x128xf32> to vector<16x128xf32>
    %185 = arith.addf %184, %183 : vector<16x128xf32>
    %186 = vector.extract_strided_slice %9 {offsets = [4, 0], sizes = [1, 128], strides = [1, 1]} : vector<9x128xf32> to vector<1x128xf32>
    %187 = vector.broadcast %186 : vector<1x128xf32> to vector<16x128xf32>
    %188 = arith.mulf %187, %141 : vector<16x128xf32>
    %189 = arith.addf %185, %188 : vector<16x128xf32>
    %190 = vector.extract_strided_slice %9 {offsets = [5, 0], sizes = [1, 128], strides = [1, 1]} : vector<9x128xf32> to vector<1x128xf32>
    %191 = vector.broadcast %190 : vector<1x128xf32> to vector<16x128xf32>
    %192 = arith.mulf %191, %160 : vector<16x128xf32>
    %193 = arith.addf %189, %192 : vector<16x128xf32>
    %194 = vector.extract_strided_slice %19 {offsets = [1, 0], sizes = [1, 128], strides = [1, 1]} : vector<3x128xf32> to vector<1x128xf32>
    %195 = math.tanh %193 : vector<16x128xf32>
    %196 = vector.broadcast %194 : vector<1x128xf32> to vector<16x128xf32>
    %197 = arith.mulf %196, %195 : vector<16x128xf32>
    %198 = arith.addf %193, %197 : vector<16x128xf32>
    %199 = vector.extract_strided_slice %14 {offsets = [2, 0], sizes = [1, 128], strides = [1, 1]} : vector<3x128xf32> to vector<1x128xf32>
    %200 = vector.extract_strided_slice %9 {offsets = [6, 0], sizes = [1, 128], strides = [1, 1]} : vector<9x128xf32> to vector<1x128xf32>
    %201 = vector.broadcast %200 : vector<1x128xf32> to vector<16x128xf32>
    %202 = arith.mulf %201, %122 : vector<16x128xf32>
    %203 = vector.broadcast %199 : vector<1x128xf32> to vector<16x128xf32>
    %204 = arith.addf %203, %202 : vector<16x128xf32>
    %205 = vector.extract_strided_slice %9 {offsets = [7, 0], sizes = [1, 128], strides = [1, 1]} : vector<9x128xf32> to vector<1x128xf32>
    %206 = vector.broadcast %205 : vector<1x128xf32> to vector<16x128xf32>
    %207 = arith.mulf %206, %141 : vector<16x128xf32>
    %208 = arith.addf %204, %207 : vector<16x128xf32>
    %209 = vector.extract_strided_slice %9 {offsets = [8, 0], sizes = [1, 128], strides = [1, 1]} : vector<9x128xf32> to vector<1x128xf32>
    %210 = vector.broadcast %209 : vector<1x128xf32> to vector<16x128xf32>
    %211 = arith.mulf %210, %160 : vector<16x128xf32>
    %212 = arith.addf %208, %211 : vector<16x128xf32>
    %213 = vector.extract_strided_slice %19 {offsets = [2, 0], sizes = [1, 128], strides = [1, 1]} : vector<3x128xf32> to vector<1x128xf32>
    %214 = math.tanh %212 : vector<16x128xf32>
    %215 = vector.broadcast %213 : vector<1x128xf32> to vector<16x128xf32>
    %216 = arith.mulf %215, %214 : vector<16x128xf32>
    %217 = arith.addf %212, %216 : vector<16x128xf32>
    %218 = vector.extract_strided_slice %15 {offsets = [0, 0], sizes = [1, 128], strides = [1, 1]} : vector<3x128xf32> to vector<1x128xf32>
    %219 = vector.extract_strided_slice %10 {offsets = [0, 0], sizes = [1, 128], strides = [1, 1]} : vector<9x128xf32> to vector<1x128xf32>
    %220 = vector.broadcast %219 : vector<1x128xf32> to vector<16x128xf32>
    %221 = arith.mulf %220, %179 : vector<16x128xf32>
    %222 = vector.broadcast %218 : vector<1x128xf32> to vector<16x128xf32>
    %223 = arith.addf %222, %221 : vector<16x128xf32>
    %224 = vector.extract_strided_slice %10 {offsets = [1, 0], sizes = [1, 128], strides = [1, 1]} : vector<9x128xf32> to vector<1x128xf32>
    %225 = vector.broadcast %224 : vector<1x128xf32> to vector<16x128xf32>
    %226 = arith.mulf %225, %198 : vector<16x128xf32>
    %227 = arith.addf %223, %226 : vector<16x128xf32>
    %228 = vector.extract_strided_slice %10 {offsets = [2, 0], sizes = [1, 128], strides = [1, 1]} : vector<9x128xf32> to vector<1x128xf32>
    %229 = vector.broadcast %228 : vector<1x128xf32> to vector<16x128xf32>
    %230 = arith.mulf %229, %217 : vector<16x128xf32>
    %231 = arith.addf %227, %230 : vector<16x128xf32>
    %232 = vector.extract_strided_slice %20 {offsets = [0, 0], sizes = [1, 128], strides = [1, 1]} : vector<3x128xf32> to vector<1x128xf32>
    %233 = math.tanh %231 : vector<16x128xf32>
    %234 = vector.broadcast %232 : vector<1x128xf32> to vector<16x128xf32>
    %235 = arith.mulf %234, %233 : vector<16x128xf32>
    %236 = arith.addf %231, %235 : vector<16x128xf32>
    %237 = vector.extract_strided_slice %15 {offsets = [1, 0], sizes = [1, 128], strides = [1, 1]} : vector<3x128xf32> to vector<1x128xf32>
    %238 = vector.extract_strided_slice %10 {offsets = [3, 0], sizes = [1, 128], strides = [1, 1]} : vector<9x128xf32> to vector<1x128xf32>
    %239 = vector.broadcast %238 : vector<1x128xf32> to vector<16x128xf32>
    %240 = arith.mulf %239, %179 : vector<16x128xf32>
    %241 = vector.broadcast %237 : vector<1x128xf32> to vector<16x128xf32>
    %242 = arith.addf %241, %240 : vector<16x128xf32>
    %243 = vector.extract_strided_slice %10 {offsets = [4, 0], sizes = [1, 128], strides = [1, 1]} : vector<9x128xf32> to vector<1x128xf32>
    %244 = vector.broadcast %243 : vector<1x128xf32> to vector<16x128xf32>
    %245 = arith.mulf %244, %198 : vector<16x128xf32>
    %246 = arith.addf %242, %245 : vector<16x128xf32>
    %247 = vector.extract_strided_slice %10 {offsets = [5, 0], sizes = [1, 128], strides = [1, 1]} : vector<9x128xf32> to vector<1x128xf32>
    %248 = vector.broadcast %247 : vector<1x128xf32> to vector<16x128xf32>
    %249 = arith.mulf %248, %217 : vector<16x128xf32>
    %250 = arith.addf %246, %249 : vector<16x128xf32>
    %251 = vector.extract_strided_slice %20 {offsets = [1, 0], sizes = [1, 128], strides = [1, 1]} : vector<3x128xf32> to vector<1x128xf32>
    %252 = math.tanh %250 : vector<16x128xf32>
    %253 = vector.broadcast %251 : vector<1x128xf32> to vector<16x128xf32>
    %254 = arith.mulf %253, %252 : vector<16x128xf32>
    %255 = arith.addf %250, %254 : vector<16x128xf32>
    %256 = vector.extract_strided_slice %15 {offsets = [2, 0], sizes = [1, 128], strides = [1, 1]} : vector<3x128xf32> to vector<1x128xf32>
    %257 = vector.extract_strided_slice %10 {offsets = [6, 0], sizes = [1, 128], strides = [1, 1]} : vector<9x128xf32> to vector<1x128xf32>
    %258 = vector.broadcast %257 : vector<1x128xf32> to vector<16x128xf32>
    %259 = arith.mulf %258, %179 : vector<16x128xf32>
    %260 = vector.broadcast %256 : vector<1x128xf32> to vector<16x128xf32>
    %261 = arith.addf %260, %259 : vector<16x128xf32>
    %262 = vector.extract_strided_slice %10 {offsets = [7, 0], sizes = [1, 128], strides = [1, 1]} : vector<9x128xf32> to vector<1x128xf32>
    %263 = vector.broadcast %262 : vector<1x128xf32> to vector<16x128xf32>
    %264 = arith.mulf %263, %198 : vector<16x128xf32>
    %265 = arith.addf %261, %264 : vector<16x128xf32>
    %266 = vector.extract_strided_slice %10 {offsets = [8, 0], sizes = [1, 128], strides = [1, 1]} : vector<9x128xf32> to vector<1x128xf32>
    %267 = vector.broadcast %266 : vector<1x128xf32> to vector<16x128xf32>
    %268 = arith.mulf %267, %217 : vector<16x128xf32>
    %269 = arith.addf %265, %268 : vector<16x128xf32>
    %270 = vector.extract_strided_slice %20 {offsets = [2, 0], sizes = [1, 128], strides = [1, 1]} : vector<3x128xf32> to vector<1x128xf32>
    %271 = math.tanh %269 : vector<16x128xf32>
    %272 = vector.broadcast %270 : vector<1x128xf32> to vector<16x128xf32>
    %273 = arith.mulf %272, %271 : vector<16x128xf32>
    %274 = arith.addf %269, %273 : vector<16x128xf32>
    %275 = vector.extract_strided_slice %11 {offsets = [0, 0], sizes = [1, 128], strides = [1, 1]} : vector<3x128xf32> to vector<1x128xf32>
    %276 = vector.broadcast %275 : vector<1x128xf32> to vector<16x128xf32>
    %277 = arith.mulf %276, %236 : vector<16x128xf32>
    %278 = vector.broadcast %16 : vector<1x128xf32> to vector<16x128xf32>
    %279 = arith.addf %278, %277 : vector<16x128xf32>
    %280 = vector.extract_strided_slice %11 {offsets = [1, 0], sizes = [1, 128], strides = [1, 1]} : vector<3x128xf32> to vector<1x128xf32>
    %281 = vector.broadcast %280 : vector<1x128xf32> to vector<16x128xf32>
    %282 = arith.mulf %281, %255 : vector<16x128xf32>
    %283 = arith.addf %279, %282 : vector<16x128xf32>
    %284 = vector.extract_strided_slice %11 {offsets = [2, 0], sizes = [1, 128], strides = [1, 1]} : vector<3x128xf32> to vector<1x128xf32>
    %285 = vector.broadcast %284 : vector<1x128xf32> to vector<16x128xf32>
    %286 = arith.mulf %285, %274 : vector<16x128xf32>
    %287 = arith.addf %283, %286 : vector<16x128xf32>
    %288 = vector.extract_strided_slice %287 {offsets = [0, 0], sizes = [8, 128], strides = [1, 1]} : vector<16x128xf32> to vector<8x128xf32>
    %289 = vector.extract_strided_slice %287 {offsets = [8, 0], sizes = [8, 128], strides = [1, 1]} : vector<16x128xf32> to vector<8x128xf32>
    %290 = arith.addf %288, %289 : vector<8x128xf32>
    %cst_52 = arith.constant 0.000000e+00 : f32
    %291 = vector.broadcast %cst_52 : f32 to vector<8x128xf32>
    %292 = arith.cmpf ogt, %290, %291 : vector<8x128xf32>
    %cst_53 = arith.constant 0.000000e+00 : f32
    %293 = vector.broadcast %cst_53 : f32 to vector<8x128xf32>
    %294 = arith.cmpf olt, %290, %293 : vector<8x128xf32>
    %cst_54 = arith.constant -1.000000e+00 : f32
    %cst_55 = arith.constant 0.000000e+00 : f32
    %295 = vector.broadcast %cst_54 : f32 to vector<8x128xf32>
    %296 = vector.broadcast %cst_55 : f32 to vector<8x128xf32>
    %297 = arith.select %294, %295, %296 : vector<8x128xi1>, vector<8x128xf32>
    %cst_56 = arith.constant 1.000000e+00 : f32
    %298 = vector.broadcast %cst_56 : f32 to vector<8x128xf32>
    %299 = arith.select %292, %298, %297 : vector<8x128xi1>, vector<8x128xf32>
    %cst_57 = arith.constant 0.000000e+00 : f32
    %300 = vector.broadcast %cst_57 : f32 to vector<8x128xf32>
    %301 = arith.subf %300, %299 : vector<8x128xf32>
    %302 = arith.mulf %301, %289 : vector<8x128xf32>
    %303 = math.absf %302 : vector<8x128xf32>
    %cst_58 = arith.constant 0.000000e+00 : f32
    %304 = vector.broadcast %cst_58 : f32 to vector<8x128xf32>
    %305 = arith.subf %304, %303 : vector<8x128xf32>
    %306 = math.exp %305 : vector<8x128xf32>
    %cst_59 = arith.constant 1.000000e+00 : f32
    %307 = vector.broadcast %cst_59 : f32 to vector<8x128xf32>
    %308 = arith.addf %307, %306 : vector<8x128xf32>
    %309 = arith.divf %306, %308 : vector<8x128xf32>
    %cst_60 = arith.constant 0.000000e+00 : f32
    %310 = vector.broadcast %cst_60 : f32 to vector<8x128xf32>
    %311 = arith.cmpf oge, %302, %310 : vector<8x128xf32>
    %cst_61 = arith.constant 1.000000e+00 : f32
    %312 = vector.broadcast %cst_61 : f32 to vector<8x128xf32>
    %313 = arith.subf %312, %309 : vector<8x128xf32>
    %314 = arith.select %311, %313, %309 : vector<8x128xi1>, vector<8x128xf32>
    %315 = arith.mulf %301, %288 : vector<8x128xf32>
    %316 = math.absf %315 : vector<8x128xf32>
    %cst_62 = arith.constant 0.000000e+00 : f32
    %317 = vector.broadcast %cst_62 : f32 to vector<8x128xf32>
    %318 = arith.subf %317, %316 : vector<8x128xf32>
    %319 = math.exp %318 : vector<8x128xf32>
    %cst_63 = arith.constant 1.000000e+00 : f32
    %320 = vector.broadcast %cst_63 : f32 to vector<8x128xf32>
    %321 = arith.addf %320, %319 : vector<8x128xf32>
    %322 = arith.divf %319, %321 : vector<8x128xf32>
    %cst_64 = arith.constant 0.000000e+00 : f32
    %323 = vector.broadcast %cst_64 : f32 to vector<8x128xf32>
    %324 = arith.cmpf oge, %315, %323 : vector<8x128xf32>
    %cst_65 = arith.constant 1.000000e+00 : f32
    %325 = vector.broadcast %cst_65 : f32 to vector<8x128xf32>
    %326 = arith.subf %325, %322 : vector<8x128xf32>
    %327 = arith.select %324, %326, %322 : vector<8x128xi1>, vector<8x128xf32>
    %328 = arith.subf %314, %327 : vector<8x128xf32>
    %329 = math.absf %328 : vector<8x128xf32>
    %cst_66 = arith.constant 9.99999971E-10 : f32
    %330 = vector.broadcast %cst_66 : f32 to vector<8x128xf32>
    %331 = arith.maximumf %329, %330 : vector<8x128xf32>
    %332 = arith.truncf %65 : vector<8x128xf32> to vector<8x128xbf16>
    %cst_67 = arith.constant dense<0.000000e+00> : vector<8x128xf32>
    %333 = tpu.matmul %332, %3, %cst_67 {dimension_numbers = #tpu.dot_dimension_numbers<[1], [0], [0], [1], [0, 0, 1, 1], [], []>} : vector<8x128xbf16>, vector<128x128xbf16>, vector<8x128xf32> -> vector<8x128xf32>
    %334 = vector.broadcast %4 : vector<1x128xf32> to vector<8x128xf32>
    %335 = arith.addf %333, %334 : vector<8x128xf32>
    %cst_68 = arith.constant 0.000000e+00 : f32
    %336 = vector.broadcast %cst_68 : f32 to vector<8x128xf32>
    %337 = arith.cmpf oge, %335, %336 : vector<8x128xf32>
    %cst_69 = arith.constant 0.00999999977 : f32
    %338 = vector.broadcast %cst_69 : f32 to vector<8x128xf32>
    %339 = arith.mulf %338, %335 : vector<8x128xf32>
    %340 = arith.select %337, %335, %339 : vector<8x128xi1>, vector<8x128xf32>
    %cst_70 = arith.constant dense<0.000000e+00> : vector<8x128xf32>
    %341 = tpu.matmul %332, %5, %cst_70 {dimension_numbers = #tpu.dot_dimension_numbers<[1], [0], [0], [1], [0, 0, 1, 1], [], []>} : vector<8x128xbf16>, vector<128x128xbf16>, vector<8x128xf32> -> vector<8x128xf32>
    %342 = vector.broadcast %6 : vector<1x128xf32> to vector<8x128xf32>
    %343 = arith.addf %341, %342 : vector<8x128xf32>
    %cst_71 = arith.constant 0.000000e+00 : f32
    %344 = vector.broadcast %cst_71 : f32 to vector<8x128xf32>
    %345 = arith.cmpf oge, %343, %344 : vector<8x128xf32>
    %cst_72 = arith.constant 0.00999999977 : f32
    %346 = vector.broadcast %cst_72 : f32 to vector<8x128xf32>
    %347 = arith.mulf %346, %343 : vector<8x128xf32>
    %348 = arith.select %345, %343, %347 : vector<8x128xi1>, vector<8x128xf32>
    %349 = arith.subf %22, %340 : vector<8x128xf32>
    %350 = math.absf %349 : vector<8x128xf32>
    %cst_73 = arith.constant 1.100000e-01 : f32
    %351 = vector.broadcast %cst_73 : f32 to vector<8x128xf32>
    %352 = arith.maximumf %348, %351 : vector<8x128xf32>
    %353 = tpu.reciprocal %352 {approx = true} : vector<8x128xf32> -> vector<8x128xf32>
    %cst_74 = arith.constant 5.000000e-01 : f32
    %354 = vector.broadcast %cst_74 : f32 to vector<8x128xf32>
    %355 = arith.subf %354, %350 : vector<8x128xf32>
    %356 = arith.mulf %355, %353 : vector<8x128xf32>
    %cst_75 = arith.constant 0.707106769 : f32
    %357 = vector.broadcast %cst_75 : f32 to vector<8x128xf32>
    %358 = arith.mulf %356, %357 : vector<8x128xf32>
    %cst_76 = arith.constant 0.000000e+00 : f32
    %359 = vector.broadcast %cst_76 : f32 to vector<8x128xf32>
    %360 = arith.cmpf ogt, %358, %359 : vector<8x128xf32>
    %cst_77 = arith.constant 0.000000e+00 : f32
    %361 = vector.broadcast %cst_77 : f32 to vector<8x128xf32>
    %362 = arith.cmpf olt, %358, %361 : vector<8x128xf32>
    %cst_78 = arith.constant -1.000000e+00 : f32
    %cst_79 = arith.constant 0.000000e+00 : f32
    %363 = vector.broadcast %cst_78 : f32 to vector<8x128xf32>
    %364 = vector.broadcast %cst_79 : f32 to vector<8x128xf32>
    %365 = arith.select %362, %363, %364 : vector<8x128xi1>, vector<8x128xf32>
    %cst_80 = arith.constant 1.000000e+00 : f32
    %366 = vector.broadcast %cst_80 : f32 to vector<8x128xf32>
    %367 = arith.select %360, %366, %365 : vector<8x128xi1>, vector<8x128xf32>
    %368 = math.absf %358 : vector<8x128xf32>
    %cst_81 = arith.constant 0.327591091 : f32
    %369 = vector.broadcast %cst_81 : f32 to vector<8x128xf32>
    %370 = arith.mulf %369, %368 : vector<8x128xf32>
    %cst_82 = arith.constant 1.000000e+00 : f32
    %371 = vector.broadcast %cst_82 : f32 to vector<8x128xf32>
    %372 = arith.addf %371, %370 : vector<8x128xf32>
    %373 = tpu.reciprocal %372 {approx = true} : vector<8x128xf32> -> vector<8x128xf32>
    %cst_83 = arith.constant 1.06140542 : f32
    %374 = vector.broadcast %cst_83 : f32 to vector<8x128xf32>
    %375 = arith.mulf %374, %373 : vector<8x128xf32>
    %cst_84 = arith.constant -1.45315206 : f32
    %376 = vector.broadcast %cst_84 : f32 to vector<8x128xf32>
    %377 = arith.addf %375, %376 : vector<8x128xf32>
    %378 = arith.mulf %377, %373 : vector<8x128xf32>
    %cst_85 = arith.constant 1.42141378 : f32
    %379 = vector.broadcast %cst_85 : f32 to vector<8x128xf32>
    %380 = arith.addf %378, %379 : vector<8x128xf32>
    %381 = arith.mulf %380, %373 : vector<8x128xf32>
    %cst_86 = arith.constant -0.284496725 : f32
    %382 = vector.broadcast %cst_86 : f32 to vector<8x128xf32>
    %383 = arith.addf %381, %382 : vector<8x128xf32>
    %384 = arith.mulf %383, %373 : vector<8x128xf32>
    %cst_87 = arith.constant 0.254829586 : f32
    %385 = vector.broadcast %cst_87 : f32 to vector<8x128xf32>
    %386 = arith.addf %384, %385 : vector<8x128xf32>
    %387 = arith.mulf %386, %373 : vector<8x128xf32>
    %cst_88 = arith.constant 0.000000e+00 : f32
    %388 = vector.broadcast %cst_88 : f32 to vector<8x128xf32>
    %389 = arith.subf %388, %368 : vector<8x128xf32>
    %390 = arith.mulf %389, %368 : vector<8x128xf32>
    %391 = math.exp %390 : vector<8x128xf32>
    %392 = arith.mulf %387, %391 : vector<8x128xf32>
    %cst_89 = arith.constant 1.000000e+00 : f32
    %393 = vector.broadcast %cst_89 : f32 to vector<8x128xf32>
    %394 = arith.subf %393, %392 : vector<8x128xf32>
    %395 = arith.mulf %367, %394 : vector<8x128xf32>
    %cst_90 = arith.constant 1.000000e+00 : f32
    %396 = vector.broadcast %cst_90 : f32 to vector<8x128xf32>
    %397 = arith.addf %396, %395 : vector<8x128xf32>
    %cst_91 = arith.constant 5.000000e-01 : f32
    %398 = vector.broadcast %cst_91 : f32 to vector<8x128xf32>
    %399 = arith.mulf %398, %397 : vector<8x128xf32>
    %cst_92 = arith.constant -5.000000e-01 : f32
    %400 = vector.broadcast %cst_92 : f32 to vector<8x128xf32>
    %401 = arith.subf %400, %350 : vector<8x128xf32>
    %402 = arith.mulf %401, %353 : vector<8x128xf32>
    %cst_93 = arith.constant 0.707106769 : f32
    %403 = vector.broadcast %cst_93 : f32 to vector<8x128xf32>
    %404 = arith.mulf %402, %403 : vector<8x128xf32>
    %cst_94 = arith.constant 0.000000e+00 : f32
    %405 = vector.broadcast %cst_94 : f32 to vector<8x128xf32>
    %406 = arith.cmpf ogt, %404, %405 : vector<8x128xf32>
    %cst_95 = arith.constant 0.000000e+00 : f32
    %407 = vector.broadcast %cst_95 : f32 to vector<8x128xf32>
    %408 = arith.cmpf olt, %404, %407 : vector<8x128xf32>
    %cst_96 = arith.constant -1.000000e+00 : f32
    %cst_97 = arith.constant 0.000000e+00 : f32
    %409 = vector.broadcast %cst_96 : f32 to vector<8x128xf32>
    %410 = vector.broadcast %cst_97 : f32 to vector<8x128xf32>
    %411 = arith.select %408, %409, %410 : vector<8x128xi1>, vector<8x128xf32>
    %cst_98 = arith.constant 1.000000e+00 : f32
    %412 = vector.broadcast %cst_98 : f32 to vector<8x128xf32>
    %413 = arith.select %406, %412, %411 : vector<8x128xi1>, vector<8x128xf32>
    %414 = math.absf %404 : vector<8x128xf32>
    %cst_99 = arith.constant 0.327591091 : f32
    %415 = vector.broadcast %cst_99 : f32 to vector<8x128xf32>
    %416 = arith.mulf %415, %414 : vector<8x128xf32>
    %cst_100 = arith.constant 1.000000e+00 : f32
    %417 = vector.broadcast %cst_100 : f32 to vector<8x128xf32>
    %418 = arith.addf %417, %416 : vector<8x128xf32>
    %419 = tpu.reciprocal %418 {approx = true} : vector<8x128xf32> -> vector<8x128xf32>
    %cst_101 = arith.constant 1.06140542 : f32
    %420 = vector.broadcast %cst_101 : f32 to vector<8x128xf32>
    %421 = arith.mulf %420, %419 : vector<8x128xf32>
    %cst_102 = arith.constant -1.45315206 : f32
    %422 = vector.broadcast %cst_102 : f32 to vector<8x128xf32>
    %423 = arith.addf %421, %422 : vector<8x128xf32>
    %424 = arith.mulf %423, %419 : vector<8x128xf32>
    %cst_103 = arith.constant 1.42141378 : f32
    %425 = vector.broadcast %cst_103 : f32 to vector<8x128xf32>
    %426 = arith.addf %424, %425 : vector<8x128xf32>
    %427 = arith.mulf %426, %419 : vector<8x128xf32>
    %cst_104 = arith.constant -0.284496725 : f32
    %428 = vector.broadcast %cst_104 : f32 to vector<8x128xf32>
    %429 = arith.addf %427, %428 : vector<8x128xf32>
    %430 = arith.mulf %429, %419 : vector<8x128xf32>
    %cst_105 = arith.constant 0.254829586 : f32
    %431 = vector.broadcast %cst_105 : f32 to vector<8x128xf32>
    %432 = arith.addf %430, %431 : vector<8x128xf32>
    %433 = arith.mulf %432, %419 : vector<8x128xf32>
    %cst_106 = arith.constant 0.000000e+00 : f32
    %434 = vector.broadcast %cst_106 : f32 to vector<8x128xf32>
    %435 = arith.subf %434, %414 : vector<8x128xf32>
    %436 = arith.mulf %435, %414 : vector<8x128xf32>
    %437 = math.exp %436 : vector<8x128xf32>
    %438 = arith.mulf %433, %437 : vector<8x128xf32>
    %cst_107 = arith.constant 1.000000e+00 : f32
    %439 = vector.broadcast %cst_107 : f32 to vector<8x128xf32>
    %440 = arith.subf %439, %438 : vector<8x128xf32>
    %441 = arith.mulf %413, %440 : vector<8x128xf32>
    %cst_108 = arith.constant 1.000000e+00 : f32
    %442 = vector.broadcast %cst_108 : f32 to vector<8x128xf32>
    %443 = arith.addf %442, %441 : vector<8x128xf32>
    %cst_109 = arith.constant 5.000000e-01 : f32
    %444 = vector.broadcast %cst_109 : f32 to vector<8x128xf32>
    %445 = arith.mulf %444, %443 : vector<8x128xf32>
    %446 = arith.subf %399, %445 : vector<8x128xf32>
    %cst_110 = arith.constant 9.99999971E-10 : f32
    %447 = vector.broadcast %cst_110 : f32 to vector<8x128xf32>
    %448 = arith.maximumf %446, %447 : vector<8x128xf32>
    %449 = math.log %448 : vector<8x128xf32>
    %cst_111 = arith.constant 0.000000e+00 : f32
    %450 = vector.broadcast %cst_111 : f32 to vector<8x128xf32>
    %451 = arith.subf %450, %449 : vector<8x128xf32>
    %cst_112 = arith.constant 0.000000e+00 : f32
    %452 = vector.broadcast %cst_112 : f32 to vector<8x128xf32>
    %453 = arith.select %34, %451, %452 : vector<8x128xi1>, vector<8x128xf32>
    %454 = vector.shape_cast %453 : vector<8x128xf32> to vector<1x8x128xf32>
    %cst_113 = arith.constant dense<0.000000e+00> : vector<1xf32>
    %455 = vector.multi_reduction <add>, %454, %cst_113 [1, 2] : vector<1x8x128xf32> to vector<1xf32>
    %456 = vector.shape_cast %455 : vector<1xf32> to vector<1x1x1xf32>
    %457 = vector.extract %456[0, 0, 0] : f32 from vector<1x1x1xf32>
    %458 = math.log %331 : vector<8x128xf32>
    %cst_114 = arith.constant 0.000000e+00 : f32
    %459 = vector.broadcast %cst_114 : f32 to vector<8x128xf32>
    %460 = arith.subf %459, %458 : vector<8x128xf32>
    %cst_115 = arith.constant 0.000000e+00 : f32
    %461 = vector.broadcast %cst_115 : f32 to vector<8x128xf32>
    %462 = arith.select %40, %460, %461 : vector<8x128xi1>, vector<8x128xf32>
    %463 = vector.shape_cast %462 : vector<8x128xf32> to vector<1x8x128xf32>
    %cst_116 = arith.constant dense<0.000000e+00> : vector<1xf32>
    %464 = vector.multi_reduction <add>, %463, %cst_116 [1, 2] : vector<1x8x128xf32> to vector<1xf32>
    %465 = vector.shape_cast %464 : vector<1xf32> to vector<1x1x1xf32>
    %466 = vector.extract %465[0, 0, 0] : f32 from vector<1x1x1xf32>
    %467 = tpu.iota {dimensions = array<i32: 1>} : vector<1x8x128xi32>
    %468 = tpu.iota {dimensions = array<i32: 2>} : vector<1x8x128xi32>
    %c0_i32 = arith.constant 0 : i32
    %469 = vector.broadcast %c0_i32 : i32 to vector<1x8x128xi32>
    %470 = arith.cmpi eq, %467, %469 : vector<1x8x128xi32>
    %c0_i32_117 = arith.constant 0 : i32
    %471 = vector.broadcast %c0_i32_117 : i32 to vector<1x8x128xi32>
    %472 = arith.cmpi eq, %468, %471 : vector<1x8x128xi32>
    %473 = arith.andi %470, %472 : vector<1x8x128xi1>
    %c0_i32_118 = arith.constant 0 : i32
    %474 = vector.broadcast %c0_i32_118 : i32 to vector<1x8x128xi32>
    %475 = arith.cmpi eq, %467, %474 : vector<1x8x128xi32>
    %c1_i32 = arith.constant 1 : i32
    %476 = vector.broadcast %c1_i32 : i32 to vector<1x8x128xi32>
    %477 = arith.cmpi eq, %468, %476 : vector<1x8x128xi32>
    %478 = arith.andi %475, %477 : vector<1x8x128xi1>
    %cst_119 = arith.constant 0.000000e+00 : f32
    %479 = vector.broadcast %466 : f32 to vector<1x8x128xf32>
    %480 = vector.broadcast %cst_119 : f32 to vector<1x8x128xf32>
    %481 = arith.select %478, %479, %480 : vector<1x8x128xi1>, vector<1x8x128xf32>
    %482 = vector.broadcast %457 : f32 to vector<1x8x128xf32>
    %483 = arith.select %473, %482, %481 : vector<1x8x128xi1>, vector<1x8x128xf32>
    %c0_120 = arith.constant 0 : index
    %c0_121 = arith.constant 0 : index
    %c0_122 = arith.constant 0 : index
    %484 = vector.load %arg23[%c0_120, %c0_121, %c0_122] : memref<1x8x128xf32, #tpu.memory_space<vmem>>, vector<1x8x128xf32>
    tpu.vector_store %arg23[%c0_120, %c0_121, %c0_122], %483 {strides = array<i32>} : memref<1x8x128xf32, #tpu.memory_space<vmem>>, vector<1x8x128xf32>,
    return
  }
  func.func @transform_0(%arg0: i32) -> (i32, i32) {
    %c0_i32 = arith.constant 0 : i32
    %c0_i32_0 = arith.constant 0 : i32
    return %arg0, %c0_i32 : i32, i32
  }
  func.func @transform_1(%arg0: i32) -> (i32, i32) {
    %c0_i32 = arith.constant 0 : i32
    %c0_i32_0 = arith.constant 0 : i32
    %c0_i32_1 = arith.constant 0 : i32
    return %c0_i32, %c0_i32_0 : i32, i32
  }
  func.func @transform_2(%arg0: i32) -> (i32, i32) {
    %c0_i32 = arith.constant 0 : i32
    %c0_i32_0 = arith.constant 0 : i32
    %c0_i32_1 = arith.constant 0 : i32
    return %c0_i32, %c0_i32_0 : i32, i32
  }
  func.func @transform_3(%arg0: i32) -> (i32, i32) {
    %c0_i32 = arith.constant 0 : i32
    %c0_i32_0 = arith.constant 0 : i32
    %c0_i32_1 = arith.constant 0 : i32
    return %c0_i32, %c0_i32_0 : i32, i32
  }
  func.func @transform_4(%arg0: i32) -> (i32, i32) {
    %c0_i32 = arith.constant 0 : i32
    %c0_i32_0 = arith.constant 0 : i32
    %c0_i32_1 = arith.constant 0 : i32
    return %c0_i32, %c0_i32_0 : i32, i32
  }
  func.func @transform_5(%arg0: i32) -> (i32, i32) {
    %c0_i32 = arith.constant 0 : i32
    %c0_i32_0 = arith.constant 0 : i32
    %c0_i32_1 = arith.constant 0 : i32
    return %c0_i32, %c0_i32_0 : i32, i32
  }
  func.func @transform_6(%arg0: i32) -> (i32, i32) {
    %c0_i32 = arith.constant 0 : i32
    %c0_i32_0 = arith.constant 0 : i32
    %c0_i32_1 = arith.constant 0 : i32
    return %c0_i32, %c0_i32_0 : i32, i32
  }
  func.func @transform_7(%arg0: i32) -> (i32, i32) {
    %c0_i32 = arith.constant 0 : i32
    %c0_i32_0 = arith.constant 0 : i32
    %c0_i32_1 = arith.constant 0 : i32
    return %c0_i32, %c0_i32_0 : i32, i32
  }
  func.func @transform_8(%arg0: i32) -> (i32, i32) {
    %c0_i32 = arith.constant 0 : i32
    %c0_i32_0 = arith.constant 0 : i32
    %c0_i32_1 = arith.constant 0 : i32
    return %c0_i32, %c0_i32_0 : i32, i32
  }
  func.func @transform_9(%arg0: i32) -> (i32, i32) {
    %c0_i32 = arith.constant 0 : i32
    %c0_i32_0 = arith.constant 0 : i32
    %c0_i32_1 = arith.constant 0 : i32
    return %c0_i32, %c0_i32_0 : i32, i32
  }
  func.func @transform_10(%arg0: i32) -> (i32, i32) {
    %c0_i32 = arith.constant 0 : i32
    %c0_i32_0 = arith.constant 0 : i32
    %c0_i32_1 = arith.constant 0 : i32
    return %c0_i32, %c0_i32_0 : i32, i32
  }
  func.func @transform_11(%arg0: i32) -> (i32, i32) {
    %c0_i32 = arith.constant 0 : i32
    %c0_i32_0 = arith.constant 0 : i32
    %c0_i32_1 = arith.constant 0 : i32
    return %c0_i32, %c0_i32_0 : i32, i32
  }
  func.func @transform_12(%arg0: i32) -> (i32, i32) {
    %c0_i32 = arith.constant 0 : i32
    %c0_i32_0 = arith.constant 0 : i32
    %c0_i32_1 = arith.constant 0 : i32
    return %c0_i32, %c0_i32_0 : i32, i32
  }
  func.func @transform_13(%arg0: i32) -> (i32, i32) {
    %c0_i32 = arith.constant 0 : i32
    %c0_i32_0 = arith.constant 0 : i32
    %c0_i32_1 = arith.constant 0 : i32
    return %c0_i32, %c0_i32_0 : i32, i32
  }
  func.func @transform_14(%arg0: i32) -> (i32, i32) {
    %c0_i32 = arith.constant 0 : i32
    %c0_i32_0 = arith.constant 0 : i32
    %c0_i32_1 = arith.constant 0 : i32
    return %c0_i32, %c0_i32_0 : i32, i32
  }
  func.func @transform_15(%arg0: i32) -> (i32, i32) {
    %c0_i32 = arith.constant 0 : i32
    %c0_i32_0 = arith.constant 0 : i32
    %c0_i32_1 = arith.constant 0 : i32
    return %c0_i32, %c0_i32_0 : i32, i32
  }
  func.func @transform_16(%arg0: i32) -> (i32, i32) {
    %c0_i32 = arith.constant 0 : i32
    %c0_i32_0 = arith.constant 0 : i32
    %c0_i32_1 = arith.constant 0 : i32
    return %c0_i32, %c0_i32_0 : i32, i32
  }
  func.func @transform_17(%arg0: i32) -> (i32, i32) {
    %c0_i32 = arith.constant 0 : i32
    %c0_i32_0 = arith.constant 0 : i32
    %c0_i32_1 = arith.constant 0 : i32
    return %c0_i32, %c0_i32_0 : i32, i32
  }
  func.func @transform_18(%arg0: i32) -> (i32, i32) {
    %c0_i32 = arith.constant 0 : i32
    %c0_i32_0 = arith.constant 0 : i32
    %c0_i32_1 = arith.constant 0 : i32
    return %c0_i32, %c0_i32_0 : i32, i32
  }
  func.func @transform_19(%arg0: i32) -> (i32, i32) {
    %c0_i32 = arith.constant 0 : i32
    %c0_i32_0 = arith.constant 0 : i32
    %c0_i32_1 = arith.constant 0 : i32
    return %c0_i32, %c0_i32_0 : i32, i32
  }
  func.func @transform_20(%arg0: i32) -> (i32, i32) {
    %c0_i32 = arith.constant 0 : i32
    %c0_i32_0 = arith.constant 0 : i32
    %c0_i32_1 = arith.constant 0 : i32
    return %c0_i32, %c0_i32_0 : i32, i32
  }
  func.func @transform_21(%arg0: i32) -> (i32, i32) {
    %c0_i32 = arith.constant 0 : i32
    %c0_i32_0 = arith.constant 0 : i32
    %c0_i32_1 = arith.constant 0 : i32
    return %c0_i32, %c0_i32_0 : i32, i32
  }
  func.func @transform_22(%arg0: i32) -> (i32, i32, i32) {
    %c0_i32 = arith.constant 0 : i32
    %c0_i32_0 = arith.constant 0 : i32
    %c0_i32_1 = arith.constant 0 : i32
    return %arg0, %c0_i32, %c0_i32_0 : i32, i32, i32
  }
}

</mosaic_0001>

<bundles_post_ra>
// kernel: hyperprior_forward.1
= control target key start
LH: loop header
LB: loop body
LE: loop exit
PB: predicated region body
PF: predicated region fallthrough
CT: control target
= control target key end

     0   :  { %s2385_s0 = inlined_call_operand.vmem [shape: f32[8,128], index: 0, kind: input, shape index: {}]   ;;  %s2386_s1 = inlined_call_operand.vmem [shape: bf16[128,128], index: 1, kind: input, shape index: {}]   ;;  %s2387_s2 = inlined_call_operand.vmem [shape: f32[1,128], index: 2, kind: input, shape index: {}]   ;;  %s2388_s3 = inlined_call_operand.vmem [shape: f32[1,128], index: 3, kind: input, shape index: {}]   ;;  %s2389_s4 = inlined_call_operand.hbm [shape: bf16[128,128], index: 4, kind: input, shape index: {}]   ;;  %s2390_s5 = inlined_call_operand.hbm [shape: f32[1,128], index: 5, kind: input, shape index: {}]   ;;  %s2391_s6 = inlined_call_operand.hbm [shape: bf16[128,128], index: 6, kind: input, shape index: {}]   ;;  %s2392_s7 = inlined_call_operand.hbm [shape: f32[1,128], index: 7, kind: input, shape index: {}]   ;;  %s2393_s8 = inlined_call_operand.vmem [shape: f32[3,128], index: 8, kind: input, shape index: {}]   ;;  %s2394_s9 = inlined_call_operand.vmem [shape: f32[9,128], index: 9, kind: input, shape index: {}]   ;;  %s2395_s10 = inlined_call_operand.hbm [shape: f32[9,128], index: 10, kind: input, shape index: {}]   ;;  %s2396_s11 = inlined_call_operand.hbm [shape: f32[9,128], index: 11, kind: input, shape index: {}]   ;;  %s2397_s12 = inlined_call_operand.hbm [shape: f32[3,128], index: 12, kind: input, shape index: {}]   ;;  %s2398_s13 = inlined_call_operand.hbm [shape: f32[3,128], index: 13, kind: input, shape index: {}]   ;;  %s2399_s14 = inlined_call_operand.hbm [shape: f32[3,128], index: 14, kind: input, shape index: {}]   ;;  %s2400_s15 = inlined_call_operand.hbm [shape: f32[3,128], index: 15, kind: input, shape index: {}]   ;;  %s2401_s16 = inlined_call_operand.hbm [shape: f32[3,128], index: 16, kind: input, shape index: {}]   ;;  %s2402_s17 = inlined_call_operand.hbm [shape: f32[1,128], index: 17, kind: input, shape index: {}]   ;;  %s2403_s18 = inlined_call_operand.hbm [shape: f32[3,128], index: 18, kind: input, shape index: {}]   ;;  %s2404_s19 = inlined_call_operand.hbm [shape: f32[3,128], index: 19, kind: input, shape index: {}]   ;;  %s2405_s20 = inlined_call_operand.hbm [shape: f32[3,128], index: 20, kind: input, shape index: {}]   ;;  %s2406_s21 = inlined_call_operand.hbm [shape: f32[3,128], index: 21, kind: input, shape index: {}]   ;;  %s2407_s22 = inlined_call_operand.vmem [shape: f32[1,8,128], index: 22, kind: output, shape index: {}]  }
   0x1   :  { %2412 = sst [smem:[#allocation36_spill]] %s2385_s0 }
   0x2   :  { %2413 = sst [smem:[#allocation37_spill]] %s2386_s1 }
   0x3   :  { %2414 = sst [smem:[#allocation38_spill]] %s2387_s2 }
   0x4   :  { %2415 = sst [smem:[#allocation39_spill]] %s2388_s3 }
   0x5   :  { %2416 = sst [smem:[#allocation40_spill]] %s2389_s4 }
   0x6   :  { %2417 = sst [smem:[#allocation41_spill]] %s2390_s5 }
   0x7   :  { %2418 = sst [smem:[#allocation42_spill]] %s2391_s6 }
   0x8   :  { %27 = vsyncpa [#allocation3], 0 }
   0x9   :  { %28 = vsyncpa [#allocation5], 0 }
   0xa   :  { %29 = vsyncpa [#allocation8], 0 }
   0xb   :  { %30 = vsyncpa [#allocation11], 0 }
   0xc   :  { %31 = vsyncpa [#allocation14], 0 }
   0xd   :  { %32 = vsyncpa [#allocation17], 0 }
   0xe   :  { %33 = vsyncpa [#allocation20], 0 }
   0xf   :  { %34 = vsyncpa [#allocation23], 0 }
  0x10   :  { %35 = vsyncpa [#allocation26], 0  ;;  %s1851_s3 = smov [#allocation4]   ;;  %s1852_s29 = smov [#allocation7]  }
  0x11   :  { %s62_s28 = sshll.u32 %s1851_s3, 4  ;;  %s84_s30 = sshll.u32 %s1852_s29, 4  ;;  %s63_s28 = int_to_ptr.vmem [resolvable:$true] %s62_s28  ;;  %s85_s30 = int_to_ptr.vmem [resolvable:$true] %s84_s30 }
  0x12   :  { %s2419_s23 = sld [smem:[#allocation41_spill]] }
  0x18   :  { %s1481_s1 = scalar_lea.hbm %s2419_s23, 16 }
  0x19   :  { %p1482_p0 = scmp.ne.s32.totalorder %s2419_s23, %s1481_s1  ;;  %p1485_p1 = scmp.lt.u32.totalorder %s1481_s1, %s2419_s23 }
  0x1b   :  { %p1487_p2 = pnand %p1485_p1, %p1482_p0 }
  0x1d   :  { %1490 = shalt.err (!%p1487_p2)
}
  0x1e   :  { %s1491_s26 = scalar_lea.vmem %s63_s28, 16  ;;  %s1495_s2 = scalar_lea.vmem %s63_s28, 32 }
  0x1f   :  { %p1492_p3 = scmp.ne.s32.totalorder %s63_s28, %s1491_s26  ;;  %p1496_p4 = scmp.lt.s32.totalorder %s63_s28, %s63_s28 }
  0x20   :  { %p1497_p5 = scmp.lt.s32.totalorder %s1495_s2, %s1491_s26 }
  0x22   :  { %p1498_p6 = por %p1497_p5, %p1496_p4 }
  0x24   :  { %p1499_p7 = pnand %p1498_p6, %p1492_p3 }
  0x26   :  { %1502 = shalt.err (!%p1499_p7)
}
  0x27   :  { %65 = dma.hbm_to_vmem [thread:$0]  %s2419_s23, 16, %s63_s28, [#allocation5]  }
  0x28   :  { %s1503_s0 = scalar_lea.hbm %s2392_s7, 16 }
  0x29   :  { %p1504_p8 = scmp.ne.s32.totalorder %s2392_s7, %s1503_s0  ;;  %p1507_p9 = scmp.lt.u32.totalorder %s1503_s0, %s2392_s7 }
  0x2b   :  { %p1509_p10 = pnand %p1507_p9, %p1504_p8 }
  0x2d   :  { %1512 = shalt.err (!%p1509_p10)
}
  0x2e   :  { %s1513_s25 = scalar_lea.vmem %s85_s30, 16  ;;  %s1517_s26 = scalar_lea.vmem %s85_s30, 32 }
  0x2f   :  { %p1514_p11 = scmp.ne.s32.totalorder %s85_s30, %s1513_s25  ;;  %p1518_p12 = scmp.lt.s32.totalorder %s85_s30, %s85_s30 }
  0x30   :  { %p1519_p13 = scmp.lt.s32.totalorder %s1517_s26, %s1513_s25 }
  0x32   :  { %p1520_p0 = por %p1519_p13, %p1518_p12 }
  0x34   :  { %p1521_p1 = pnand %p1520_p0, %p1514_p11 }
  0x36   :  { %1524 = shalt.err (!%p1521_p1)
}
  0x37   :  { %87 = dma.hbm_to_vmem [thread:$0]  %s2392_s7, 16, %s85_s30, [#allocation8]  }
  0x38   :  { %s1853_s2 = smov [#allocation10]   ;;  %s1854_s3 = smov [#allocation13]  }
  0x39   :  { %s109_s27 = sshll.u32 %s1853_s2, 4  ;;  %s132_s29 = sshll.u32 %s1854_s3, 4  ;;  %s110_s27 = int_to_ptr.vmem [resolvable:$true] %s109_s27  ;;  %s133_s29 = int_to_ptr.vmem [resolvable:$true] %s132_s29 }
  0x3a   :  { %s1525_s5 = scalar_lea.hbm %s2396_s11, 256 }
  0x3b   :  { %p1526_p2 = scmp.ne.s32.totalorder %s2396_s11, %s1525_s5  ;;  %p1529_p3 = scmp.lt.u32.totalorder %s1525_s5, %s2396_s11 }
  0x3d   :  { %p1531_p4 = pnand %p1529_p3, %p1526_p2 }
  0x3f   :  { %1534 = shalt.err (!%p1531_p4)
}
  0x40   :  { %s1535_s7 = scalar_lea.vmem %s110_s27, 256  ;;  %p1540_p6 = scmp.lt.s32.totalorder %s110_s27, %s110_s27 }
  0x41   :  { %p1536_p5 = scmp.ne.s32.totalorder %s110_s27, %s1535_s7  ;;  %p1541_p7 = scmp.lt.s32.totalorder %s1535_s7, %s1535_s7 }
  0x43   :  { %p1542_p8 = por %p1541_p7, %p1540_p6 }
  0x45   :  { %p1543_p9 = pnand %p1542_p8, %p1536_p5 }
  0x47   :  { %1546 = shalt.err (!%p1543_p9)
}
  0x48   :  { %s1855_s30 = smov 128   ;;  %s1856_s26 = smov 8  }
  0x49   :  { %115 = dma.hbm_to_vmem [thread:$0]  %s2396_s11, 256, %s110_s27, [#allocation11], %s1855_s30, %s1855_s30, %s1856_s26  }
  0x4a   :  { %s1547_s4 = scalar_lea.hbm %s2398_s13, 64 }
  0x4b   :  { %p1548_p10 = scmp.ne.s32.totalorder %s2398_s13, %s1547_s4  ;;  %p1551_p11 = scmp.lt.u32.totalorder %s1547_s4, %s2398_s13 }
  0x4d   :  { %p1553_p12 = pnand %p1551_p11, %p1548_p10 }
  0x4f   :  { %1556 = shalt.err (!%p1553_p12)
}
  0x50   :  { %s1557_s6 = scalar_lea.vmem %s133_s29, 64  ;;  %p1562_p0 = scmp.lt.s32.totalorder %s133_s29, %s133_s29 }
  0x51   :  { %p1558_p13 = scmp.ne.s32.totalorder %s133_s29, %s1557_s6  ;;  %p1563_p1 = scmp.lt.s32.totalorder %s1557_s6, %s1557_s6 }
  0x53   :  { %p1564_p2 = por %p1563_p1, %p1562_p0 }
  0x55   :  { %p1565_p3 = pnand %p1564_p2, %p1558_p13 }
  0x57   :  { %1568 = shalt.err (!%p1565_p3)
}
  0x58   :  { %135 = dma.hbm_to_vmem [thread:$0]  %s2398_s13, 64, %s133_s29, [#allocation14]  }
  0x59   :  { %s1857_s25 = smov [#allocation16]   ;;  %s1858_s28 = smov [#allocation19]  }
  0x5a   :  { %s152_s7 = sshll.u32 %s1857_s25, 4  ;;  %s172_s23 = sshll.u32 %s1858_s28, 4  ;;  %s153_s7 = int_to_ptr.vmem [resolvable:$true] %s152_s7  ;;  %s173_s23 = int_to_ptr.vmem [resolvable:$true] %s172_s23 }
  0x5b   :  { %s1569_s4 = scalar_lea.hbm %s2400_s15, 64 }
  0x5c   :  { %p1570_p4 = scmp.ne.s32.totalorder %s2400_s15, %s1569_s4  ;;  %p1573_p5 = scmp.lt.u32.totalorder %s1569_s4, %s2400_s15 }
  0x5e   :  { %p1575_p6 = pnand %p1573_p5, %p1570_p4 }
  0x60   :  { %1578 = shalt.err (!%p1575_p6)
}
  0x61   :  { %s1579_s13 = scalar_lea.vmem %s153_s7, 64  ;;  %p1584_p8 = scmp.lt.s32.totalorder %s153_s7, %s153_s7 }
  0x62   :  { %p1580_p7 = scmp.ne.s32.totalorder %s153_s7, %s1579_s13  ;;  %p1585_p9 = scmp.lt.s32.totalorder %s1579_s13, %s1579_s13 }
  0x64   :  { %p1586_p10 = por %p1585_p9, %p1584_p8 }
  0x66   :  { %p1587_p11 = pnand %p1586_p10, %p1580_p7 }
  0x68   :  { %1590 = shalt.err (!%p1587_p11)
}
  0x69   :  { %155 = dma.hbm_to_vmem [thread:$0]  %s2400_s15, 64, %s153_s7, [#allocation17]  }
  0x6a   :  { %s1591_s25 = scalar_lea.hbm %s2402_s17, 16 }
  0x6b   :  { %p1592_p12 = scmp.ne.s32.totalorder %s2402_s17, %s1591_s25  ;;  %p1595_p13 = scmp.lt.u32.totalorder %s1591_s25, %s2402_s17 }
  0x6d   :  { %p1597_p0 = pnand %p1595_p13, %p1592_p12 }
  0x6f   :  { %1600 = shalt.err (!%p1597_p0)
}
  0x70   :  { %s1601_s0 = scalar_lea.vmem %s173_s23, 16  ;;  %s1605_s5 = scalar_lea.vmem %s173_s23, 32 }
  0x71   :  { %p1602_p1 = scmp.ne.s32.totalorder %s173_s23, %s1601_s0  ;;  %p1606_p2 = scmp.lt.s32.totalorder %s173_s23, %s173_s23 }
  0x72   :  { %p1607_p3 = scmp.lt.s32.totalorder %s1605_s5, %s1601_s0 }
  0x74   :  { %p1608_p4 = por %p1607_p3, %p1606_p2 }
  0x76   :  { %p1609_p5 = pnand %p1608_p4, %p1602_p1 }
  0x78   :  { %1612 = shalt.err (!%p1609_p5)
}
  0x79   :  { %175 = dma.hbm_to_vmem [thread:$0]  %s2402_s17, 16, %s173_s23, [#allocation20]  }
  0x7a   :  { %s1859_s1 = smov [#allocation22]   ;;  %s1860_s13 = smov [#allocation2]  }
  0x7b   :  { %s192_s24 = sshll.u32 %s1859_s1, 4  ;;  %s49_s29 = sshll.u32 %s1860_s13, 4  ;;  %s193_s24 = int_to_ptr.vmem [resolvable:$true] %s192_s24  ;;  %s2063_s29 = int_to_ptr.vmem [resolvable:$true] %s49_s29 }
  0x7c   :  { %s1613_s27 = scalar_lea.hbm %s2404_s19, 64 }
  0x7d   :  { %p1614_p6 = scmp.ne.s32.totalorder %s2404_s19, %s1613_s27  ;;  %p1617_p7 = scmp.lt.u32.totalorder %s1613_s27, %s2404_s19 }
  0x7f   :  { %p1619_p8 = pnand %p1617_p7, %p1614_p6 }
  0x81   :  { %1622 = shalt.err (!%p1619_p8)
}
  0x82   :  { %s1623_s17 = scalar_lea.vmem %s193_s24, 64  ;;  %p1628_p10 = scmp.lt.s32.totalorder %s193_s24, %s193_s24 }
  0x83   :  { %p1624_p9 = scmp.ne.s32.totalorder %s193_s24, %s1623_s17  ;;  %p1629_p11 = scmp.lt.s32.totalorder %s1623_s17, %s1623_s17 }
  0x85   :  { %p1630_p12 = por %p1629_p11, %p1628_p10 }
  0x87   :  { %p1631_p13 = pnand %p1630_p12, %p1624_p9 }
  0x89   :  { %1634 = shalt.err (!%p1631_p13)
}
  0x8a   :  { %195 = dma.hbm_to_vmem [thread:$0]  %s2404_s19, 64, %s193_s24, [#allocation23]  }
  0x8b   :  { %s2420_s15 = sld [smem:[#allocation40_spill]] }
  0x91   :  { %s1635_s7 = scalar_lea.hbm %s2420_s15, 1024 }
  0x92   :  { %p1636_p0 = scmp.ne.s32.totalorder %s2420_s15, %s1635_s7  ;;  %p1639_p1 = scmp.lt.u32.totalorder %s1635_s7, %s2420_s15 }
  0x94   :  { %p1641_p2 = pnand %p1639_p1, %p1636_p0 }
  0x96   :  { %1644 = shalt.err (!%p1641_p2)
}
  0x97   :  { %s1645_s27 = scalar_lea.vmem %s2063_s29, 1024  ;;  %p1650_p4 = scmp.lt.s32.totalorder %s2063_s29, %s2063_s29 }
  0x98   :  { %p1646_p3 = scmp.ne.s32.totalorder %s2063_s29, %s1645_s27  ;;  %p1651_p5 = scmp.lt.s32.totalorder %s1645_s27, %s1645_s27 }
  0x9a   :  { %p1652_p6 = por %p1651_p5, %p1650_p4 }
  0x9c   :  { %p1653_p7 = pnand %p1652_p6, %p1646_p3 }
  0x9e   :  { %1656 = shalt.err (!%p1653_p7)
}
  0x9f   :  { %s1861_s19 = smov 64   ;;  %s1862_s24 = smov 4  }
  0xa0   :  { %55 = dma.hbm_to_vmem [thread:$0]  %s2420_s15, 1024, %s2063_s29, [#allocation3], %s1861_s19, %s1861_s19, %s1862_s24  }
  0xa1   :  { %s1863_s2 = smov [#allocation6]   ;;  %s1864_s17 = smov [#allocation9]  }
  0xa2   :  { %s71_s3 = sshll.u32 %s1863_s2, 4  ;;  %s97_s23 = sshll.u32 %s1864_s17, 4  ;;  %s72_s3 = int_to_ptr.vmem [resolvable:$true] %s71_s3  ;;  %s2094_s23 = int_to_ptr.vmem [resolvable:$true] %s97_s23 }
  0xa3   :  { %s2421_s5 = sld [smem:[#allocation42_spill]] }
  0xa9   :  { %s1657_s7 = scalar_lea.hbm %s2421_s5, 1024 }
  0xaa   :  { %p1658_p8 = scmp.ne.s32.totalorder %s2421_s5, %s1657_s7  ;;  %p1661_p9 = scmp.lt.u32.totalorder %s1657_s7, %s2421_s5 }
  0xac   :  { %p1663_p10 = pnand %p1661_p9, %p1658_p8 }
  0xae   :  { %1666 = shalt.err (!%p1663_p10)
}
  0xaf   :  { %s1667_s29 = scalar_lea.vmem %s72_s3, 1024  ;;  %p1672_p12 = scmp.lt.s32.totalorder %s72_s3, %s72_s3 }
  0xb0   :  { %p1668_p11 = scmp.ne.s32.totalorder %s72_s3, %s1667_s29  ;;  %p1673_p13 = scmp.lt.s32.totalorder %s1667_s29, %s1667_s29 }
  0xb2   :  { %p1674_p0 = por %p1673_p13, %p1672_p12 }
  0xb4   :  { %p1675_p1 = pnand %p1674_p0, %p1668_p11 }
  0xb6   :  { %1678 = shalt.err (!%p1675_p1)
}
  0xb7   :  { %77 = dma.hbm_to_vmem [thread:$0]  %s2421_s5, 1024, %s72_s3, [#allocation5], %s1861_s19, %s1861_s19, %s1862_s24  }
  0xb8   :  { %s1679_s2 = scalar_lea.hbm %s2395_s10, 256 }
  0xb9   :  { %p1680_p2 = scmp.ne.s32.totalorder %s2395_s10, %s1679_s2  ;;  %p1683_p3 = scmp.lt.u32.totalorder %s1679_s2, %s2395_s10 }
  0xbb   :  { %p1685_p4 = pnand %p1683_p3, %p1680_p2 }
  0xbd   :  { %1688 = shalt.err (!%p1685_p4)
}
  0xbe   :  { %s1689_s1 = scalar_lea.vmem %s2094_s23, 256  ;;  %p1694_p6 = scmp.lt.s32.totalorder %s2094_s23, %s2094_s23 }
  0xbf   :  { %p1690_p5 = scmp.ne.s32.totalorder %s2094_s23, %s1689_s1  ;;  %p1695_p7 = scmp.lt.s32.totalorder %s1689_s1, %s1689_s1 }
  0xc1   :  { %p1696_p8 = por %p1695_p7, %p1694_p6 }
  0xc3   :  { %p1697_p9 = pnand %p1696_p8, %p1690_p5 }
  0xc5   :  { %1700 = shalt.err (!%p1697_p9)
}
  0xc6   :  { %103 = dma.hbm_to_vmem [thread:$0]  %s2395_s10, 256, %s2094_s23, [#allocation8], %s1855_s30, %s1855_s30, %s1856_s26  }
  0xc7   :  { %s1865_s3 = smov [#allocation12]   ;;  %s1866_s13 = smov [#allocation15]  }
  0xc8   :  { %s122_s5 = sshll.u32 %s1865_s3, 4  ;;  %s142_s6 = sshll.u32 %s1866_s13, 4  ;;  %s123_s5 = int_to_ptr.vmem [resolvable:$true] %s122_s5  ;;  %s143_s6 = int_to_ptr.vmem [resolvable:$true] %s142_s6 }
  0xc9   :  { %s1701_s15 = scalar_lea.hbm %s2397_s12, 64 }
  0xca   :  { %p1702_p10 = scmp.ne.s32.totalorder %s2397_s12, %s1701_s15  ;;  %p1705_p11 = scmp.lt.u32.totalorder %s1701_s15, %s2397_s12 }
  0xcc   :  { %p1707_p12 = pnand %p1705_p11, %p1702_p10 }
  0xce   :  { %1710 = shalt.err (!%p1707_p12)
}
  0xcf   :  { %s1711_s10 = scalar_lea.vmem %s123_s5, 64  ;;  %p1716_p0 = scmp.lt.s32.totalorder %s123_s5, %s123_s5 }
  0xd0   :  { %p1712_p13 = scmp.ne.s32.totalorder %s123_s5, %s1711_s10  ;;  %p1717_p1 = scmp.lt.s32.totalorder %s1711_s10, %s1711_s10 }
  0xd2   :  { %p1718_p2 = por %p1717_p1, %p1716_p0 }
  0xd4   :  { %p1719_p3 = pnand %p1718_p2, %p1712_p13 }
  0xd6   :  { %1722 = shalt.err (!%p1719_p3)
}
  0xd7   :  { %125 = dma.hbm_to_vmem [thread:$0]  %s2397_s12, 64, %s123_s5, [#allocation11]  }
  0xd8   :  { %s1723_s4 = scalar_lea.hbm %s2399_s14, 64 }
  0xd9   :  { %p1724_p4 = scmp.ne.s32.totalorder %s2399_s14, %s1723_s4  ;;  %p1727_p5 = scmp.lt.u32.totalorder %s1723_s4, %s2399_s14 }
  0xdb   :  { %p1729_p6 = pnand %p1727_p5, %p1724_p4 }
  0xdd   :  { %1732 = shalt.err (!%p1729_p6)
}
  0xde   :  { %s1733_s24 = scalar_lea.vmem %s143_s6, 64  ;;  %p1738_p8 = scmp.lt.s32.totalorder %s143_s6, %s143_s6 }
  0xdf   :  { %p1734_p7 = scmp.ne.s32.totalorder %s143_s6, %s1733_s24  ;;  %p1739_p9 = scmp.lt.s32.totalorder %s1733_s24, %s1733_s24 }
  0xe1   :  { %p1740_p10 = por %p1739_p9, %p1738_p8 }
  0xe3   :  { %p1741_p11 = pnand %p1740_p10, %p1734_p7 }
  0xe5   :  { %1744 = shalt.err (!%p1741_p11)
}
  0xe6   :  { %145 = dma.hbm_to_vmem [thread:$0]  %s2399_s14, 64, %s143_s6, [#allocation14]  }
  0xe7   :  { %s1867_s5 = smov [#allocation18]   ;;  %s1868_s11 = smov [#allocation21]  }
  0xe8   :  { %s162_s13 = sshll.u32 %s1867_s5, 4  ;;  %s182_s29 = sshll.u32 %s1868_s11, 4  ;;  %s163_s13 = int_to_ptr.vmem [resolvable:$true] %s162_s13  ;;  %s183_s29 = int_to_ptr.vmem [resolvable:$true] %s182_s29 }
  0xe9   :  { %s1745_s25 = scalar_lea.hbm %s2401_s16, 64 }
  0xea   :  { %p1746_p12 = scmp.ne.s32.totalorder %s2401_s16, %s1745_s25  ;;  %p1749_p13 = scmp.lt.u32.totalorder %s1745_s25, %s2401_s16 }
  0xec   :  { %p1751_p0 = pnand %p1749_p13, %p1746_p12 }
  0xee   :  { %1754 = shalt.err (!%p1751_p0)
}
  0xef   :  { %s1755_s14 = scalar_lea.vmem %s163_s13, 64  ;;  %p1760_p2 = scmp.lt.s32.totalorder %s163_s13, %s163_s13 }
  0xf0   :  { %p1756_p1 = scmp.ne.s32.totalorder %s163_s13, %s1755_s14  ;;  %p1761_p3 = scmp.lt.s32.totalorder %s1755_s14, %s1755_s14 }
  0xf2   :  { %p1762_p4 = por %p1761_p3, %p1760_p2 }
  0xf4   :  { %p1763_p5 = pnand %p1762_p4, %p1756_p1 }
  0xf6   :  { %1766 = shalt.err (!%p1763_p5)
}
  0xf7   :  { %165 = dma.hbm_to_vmem [thread:$0]  %s2401_s16, 64, %s163_s13, [#allocation17]  }
  0xf8   :  { %s1767_s4 = scalar_lea.hbm %s2403_s18, 64 }
  0xf9   :  { %p1768_p6 = scmp.ne.s32.totalorder %s2403_s18, %s1767_s4  ;;  %p1771_p7 = scmp.lt.u32.totalorder %s1767_s4, %s2403_s18 }
  0xfb   :  { %p1773_p8 = pnand %p1771_p7, %p1768_p6 }
  0xfd   :  { %1776 = shalt.err (!%p1773_p8)
}
  0xfe   :  { %s1777_s24 = scalar_lea.vmem %s183_s29, 64  ;;  %p1782_p10 = scmp.lt.s32.totalorder %s183_s29, %s183_s29 }
  0xff   :  { %p1778_p9 = scmp.ne.s32.totalorder %s183_s29, %s1777_s24  ;;  %p1783_p11 = scmp.lt.s32.totalorder %s1777_s24, %s1777_s24 }
 0x101   :  { %p1784_p12 = por %p1783_p11, %p1782_p10 }
 0x103   :  { %p1785_p13 = pnand %p1784_p12, %p1778_p9 }
 0x105   :  { %1788 = shalt.err (!%p1785_p13)
}
 0x106   :  { %185 = dma.hbm_to_vmem [thread:$0]  %s2403_s18, 64, %s183_s29, [#allocation20]  }
 0x107   :  { %s1869_s3 = smov [#allocation24]   ;;  %s1870_s13 = smov [#allocation25]  }
 0x108   :  { %s202_s5 = sshll.u32 %s1869_s3, 4  ;;  %s212_s11 = sshll.u32 %s1870_s13, 4  ;;  %s203_s5 = int_to_ptr.vmem [resolvable:$true] %s202_s5  ;;  %s213_s11 = int_to_ptr.vmem [resolvable:$true] %s212_s11 }
 0x109   :  { %s1789_s25 = scalar_lea.hbm %s2405_s20, 64 }
 0x10a   :  { %p1790_p0 = scmp.ne.s32.totalorder %s2405_s20, %s1789_s25  ;;  %p1793_p1 = scmp.lt.u32.totalorder %s1789_s25, %s2405_s20 }
 0x10c   :  { %p1795_p2 = pnand %p1793_p1, %p1790_p0 }
 0x10e   :  { %1798 = shalt.err (!%p1795_p2)
}
 0x10f   :  { %s1799_s18 = scalar_lea.vmem %s203_s5, 64  ;;  %p1804_p4 = scmp.lt.s32.totalorder %s203_s5, %s203_s5 }
 0x110   :  { %p1800_p3 = scmp.ne.s32.totalorder %s203_s5, %s1799_s18  ;;  %p1805_p5 = scmp.lt.s32.totalorder %s1799_s18, %s1799_s18 }
 0x112   :  { %p1806_p6 = por %p1805_p5, %p1804_p4 }
 0x114   :  { %p1807_p7 = pnand %p1806_p6, %p1800_p3 }
 0x116   :  { %1810 = shalt.err (!%p1807_p7)
}
 0x117   :  { %205 = dma.hbm_to_vmem [thread:$0]  %s2405_s20, 64, %s203_s5, [#allocation23]  }
 0x118   :  { %s1811_s23 = scalar_lea.hbm %s2406_s21, 64 }
 0x119   :  { %p1812_p8 = scmp.ne.s32.totalorder %s2406_s21, %s1811_s23  ;;  %p1815_p9 = scmp.lt.u32.totalorder %s1811_s23, %s2406_s21 }
 0x11b   :  { %p1817_p10 = pnand %p1815_p9, %p1812_p8 }
 0x11d   :  { %1820 = shalt.err (!%p1817_p10)
}
 0x11e   :  { %s1821_s1 = scalar_lea.vmem %s213_s11, 64  ;;  %p1826_p12 = scmp.lt.s32.totalorder %s213_s11, %s213_s11 }
 0x11f   :  { %p1822_p11 = scmp.ne.s32.totalorder %s213_s11, %s1821_s1  ;;  %p1827_p13 = scmp.lt.s32.totalorder %s1821_s1, %s1821_s1 }
 0x121   :  { %p1828_p0 = por %p1827_p13, %p1826_p12 }
 0x123   :  { %p1829_p1 = pnand %p1828_p0, %p1822_p11 }
 0x125   :  { %1832 = shalt.err (!%p1829_p1)
}
 0x126   :  { %215 = dma.hbm_to_vmem [thread:$0]  %s2406_s21, 64, %s213_s11, [#allocation26]  }
 0x127   :  { %1833 = dma.done.wait [#allocation3], 1024  }
 0x128   :  { %1834 = vsyncadd [#allocation3], 4294966272 }
 0x129   :  { %1835 = dma.done.wait [#allocation5], 1040  }
 0x12a   :  { %1836 = vsyncadd [#allocation5], 4294966256 }
 0x12b   :  { %1837 = dma.done.wait [#allocation8], 272  }
 0x12c   :  { %1838 = vsyncadd [#allocation8], 4294967024 }
 0x12d   :  { %1839 = dma.done.wait [#allocation11], 320  }
 0x12e   :  { %1840 = vsyncadd [#allocation11], 4294966976 }
 0x12f   :  { %1841 = dma.done.wait [#allocation14], 128  }
 0x130   :  { %1842 = vsyncadd [#allocation14], 4294967168 }
 0x131   :  { %1843 = dma.done.wait [#allocation17], 128  }
 0x132   :  { %1844 = vsyncadd [#allocation17], 4294967168 }
 0x133   :  { %1845 = dma.done.wait [#allocation20], 80  }
 0x134   :  { %1846 = vsyncadd [#allocation20], 4294967216 }
 0x135   :  { %1847 = dma.done.wait [#allocation23], 128  }
 0x136   :  { %1848 = vsyncadd [#allocation23], 4294967168 }
 0x137   :  { %1849 = dma.done.wait [#allocation26], 64  }
 0x138   :  { %1850 = vsyncadd [#allocation26], 4294967232  ;;  %v1871_v0 = vmov 0.0   ;;  %vm1872_vm0 = vmmov 0   ;;  %s2422_s16 = sld [smem:[#allocation37_spill]]  ;;  %v1395_v4 = vld [vmem:[#allocation2] sm:$0xff]   ;;  %v336_v44 = vlaneseq }
 0x139   :  { %1301 = vmatprep.subr.bf16.mxu0 %v1871_v0  ;;  %1317 = vmatprep.mubr.msk.bf16.mxu0 %vm1872_vm0, %v1871_v0  ;;  %v1397_v6 = vld [vmem:[#allocation2 + $0x8] sm:$0xff]   ;;  %v1399_v8 = vld [vmem:[#allocation2 + $0x10] sm:$0xff]   ;;  %s2423_s26 = sld [smem:[#allocation36_spill]]  ;;  %v1401_v17 = vld [vmem:[#allocation2 + $0x18] sm:$0xff]   ;;  %s2424_s4 = sld [smem:[#allocation38_spill]] }
 0x13a   :  { %1321 = vmatprep.subr.bf16.mxu1 %v1871_v0  ;;  %1337 = vmatprep.mubr.msk.bf16.mxu1 %vm1872_vm0, %v1871_v0  ;;  %v1396_v14 = vld [vmem:[#allocation6] sm:$0xff]   ;;  %v1398_v15 = vld [vmem:[#allocation6 + $0x8] sm:$0xff]   ;;  %v1400_v16 = vld [vmem:[#allocation6 + $0x10] sm:$0xff]   ;;  %s2425_s1 = sld [smem:[#allocation39_spill]]  ;;  %v2268_v45 = vshrl.u32 %v336_v44, 7 }
 0x13b   :  { %1322 = vmatpush3.bf16.msra.mxu1 %v1395_v4  ;;  %v1402_v18 = vld [vmem:[#allocation6 + $0x18] sm:$0xff]   ;;  %v1404_v20 = vld [vmem:[#allocation6 + $0x20] sm:$0xff]   ;;  %v1406_v22 = vld [vmem:[#allocation6 + $0x28] sm:$0xff]  }
 0x13c   :  { %1323 = vmatprep.subr.bf16.mxu1 %v1871_v0  ;;  %v1403_v19 = vld [vmem:[#allocation2 + $0x20] sm:$0xff]   ;;  %v1405_v21 = vld [vmem:[#allocation2 + $0x28] sm:$0xff]   ;;  %v1407_v23 = vld [vmem:[#allocation2 + $0x30] sm:$0xff]   ;;  %v2271_v46 = vsub.s32 0, %v2268_v45  ;;  %v2278_v52 = vsub.s32 1, %v2268_v45  ;;  %v2282_v56 = vsub.s32 2, %v2268_v45 }
 0x13d   :  { %v1408_v24 = vld [vmem:[#allocation6 + $0x30] sm:$0xff]   ;;  %v1410_v26 = vld [vmem:[#allocation6 + $0x38] sm:$0xff]   ;;  %v325_v51 = vld [vmem:[#allocation13] sm:$0x7] }
 0x13e   :  { %v1387_v1 = vld [vmem:[%s2422_s16] sm:$0xff]   ;;  %v1388_v2 = vld [vmem:[%s2422_s16 + $0x8] sm:$0xff]   ;;  %v1389_v3 = vld [vmem:[%s2422_s16 + $0x10] sm:$0xff]   ;;  %v473_v54 = vrot.slane %v325_v51, %v2271_v46  ;;  %v495_v61 = vrot.slane %v325_v51, %v2278_v52 }
 0x13f   :  { %1302 = vmatpush3.bf16.msra.mxu0 %v1387_v1  ;;  %v1390_v5 = vld [vmem:[%s2422_s16 + $0x18] sm:$0xff]   ;;  %v1391_v7 = vld [vmem:[%s2422_s16 + $0x20] sm:$0xff]   ;;  %1324 = vmatpush3.bf16.msra.mxu1 %v1397_v6  ;;  %v1392_v9 = vld [vmem:[%s2422_s16 + $0x28] sm:$0xff]  }
 0x140   :  { %1303 = vmatprep.subr.bf16.mxu0 %v1871_v0  ;;  %1325 = vmatprep.subr.bf16.mxu1 %v1871_v0  ;;  %v1393_v10 = vld [vmem:[%s2422_s16 + $0x30] sm:$0xff]   ;;  %v1394_v11 = vld [vmem:[%s2422_s16 + $0x38] sm:$0xff]   ;;  %v2242_v12 = vld [vmem:[%s2423_s26] sm:$0xff] }
 0x141   :  { %v347_v13 = vpack.c.bf16 %v2242_v12, %v2242_v12  ;;  %v1409_v25 = vld [vmem:[#allocation2 + $0x38] sm:$0xff]   ;;  %v1241_v27 = vld [vmem:[%s2424_s4] ss:$0 sm:$0xff] }
 0x142   :  { %v1250_v28 = vld [vmem:[%s2425_s1] ss:$0 sm:$0xff]  ;;  %v330_v6 = vld [vmem:[#allocation21] sm:$0x7] }
 0x143   :  { %1304 = vmatpush3.bf16.msra.mxu0 %v1388_v2  ;;  %1326 = vmatpush3.bf16.msra.mxu1 %v1399_v8  ;;  %v317_v47 = vld [vmem:[%s2393_s8] sm:$0x7] }
 0x144   :  { %1305 = vmatprep.subr.bf16.mxu0 %v1871_v0  ;;  %1327 = vmatprep.subr.bf16.mxu1 %v1871_v0  ;;  %v467_v49 = vrot.slane %v317_v47, %v2271_v46  ;;  %v489_v57 = vrot.slane %v317_v47, %v2278_v52  ;;  %v511_v62 = vrot.slane %v317_v47, %v2282_v56 }
 0x147   :  { %1306 = vmatpush3.bf16.msra.mxu0 %v1389_v3  ;;  %1328 = vmatpush3.bf16.msra.mxu1 %v1401_v17  ;;  %v517_v3 = vrot.slane %v325_v51, %v2282_v56 }
 0x148   :  { %1307 = vmatprep.subr.bf16.mxu0 %v1871_v0  ;;  %1329 = vmatprep.subr.bf16.mxu1 %v1871_v0 }
 0x14b   :  { %1308 = vmatpush3.bf16.msra.mxu0 %v1390_v5  ;;  %1330 = vmatpush3.bf16.msra.mxu1 %v1403_v19 }
 0x14c   :  { %1309 = vmatprep.subr.bf16.mxu0 %v1871_v0  ;;  %1331 = vmatprep.subr.bf16.mxu1 %v1871_v0 }
 0x14f   :  { %1310 = vmatpush3.bf16.msra.mxu0 %v1391_v7  ;;  %1332 = vmatpush3.bf16.msra.mxu1 %v1405_v21  ;;  %v326_v21 = vld [vmem:[#allocation15] sm:$0x7] }
 0x150   :  { %1311 = vmatprep.subr.bf16.mxu0 %v1871_v0  ;;  %1333 = vmatprep.subr.bf16.mxu1 %v1871_v0 }
 0x153   :  { %1312 = vmatpush3.bf16.msra.mxu0 %v1392_v9  ;;  %1334 = vmatpush3.bf16.msra.mxu1 %v1407_v23  ;;  %v481_v9 = vrot.slane %v330_v6, %v2271_v46 }
 0x154   :  { %1313 = vmatprep.subr.bf16.mxu0 %v1871_v0  ;;  %1335 = vmatprep.subr.bf16.mxu1 %v1871_v0 }
 0x157   :  { %1314 = vmatpush3.bf16.msra.mxu0 %v1393_v10  ;;  %1336 = vmatpush3.bf16.msra.mxu1 %v1409_v25  ;;  %v2296_v25 = vsub.s32 3, %v2268_v45 }
 0x158   :  { %1315 = vmatprep.subr.bf16.mxu0 %v1871_v0 }
 0x15b   :  { %1316 = vmatpush3.bf16.msra.mxu0 %v1394_v11 }
 0x15c   :  { %1341 = vmatprep.subr.bf16.mxu0 %v1871_v0 }
 0x15e   :  { %1318 = vmatmul.mubr.bf16.vlgmr.msra.gmra.mrb[0].mxu0 %v347_v13 }
 0x15f   :  { %1342 = vmatpush3.bf16.msra.mxu0 %v1396_v14  ;;  %1357 = vmatprep.mubr.msk.bf16.mxu0 %vm1872_vm0, %v1871_v0  ;;  %v318_v14 = vld [vmem:[%s2394_s9] sm:$0xff] }
 0x160   :  { %1343 = vmatprep.subr.bf16.mxu0 %v1871_v0 }
 0x163   :  { %1344 = vmatpush3.bf16.msra.mxu0 %v1398_v15 }
 0x164   :  { %1345 = vmatprep.subr.bf16.mxu0 %v1871_v0 }
 0x167   :  { %1346 = vmatpush3.bf16.msra.mxu0 %v1400_v16  ;;  %v503_v16 = vrot.slane %v330_v6, %v2278_v52 }
 0x168   :  { %1347 = vmatprep.subr.bf16.mxu0 %v1871_v0 }
 0x16b   :  { %1348 = vmatpush3.bf16.msra.mxu0 %v1402_v18 }
 0x16c   :  { %1349 = vmatprep.subr.bf16.mxu0 %v1871_v0 }
 0x16f   :  { %1350 = vmatpush3.bf16.msra.mxu0 %v1404_v20  ;;  %v533_v20 = vrot.slane %v318_v14, %v2271_v46 }
 0x170   :  { %1351 = vmatprep.subr.bf16.mxu0 %v1871_v0 }
 0x173   :  { %1352 = vmatpush3.bf16.msra.mxu0 %v1406_v22 }
 0x174   :  { %1353 = vmatprep.subr.bf16.mxu0 %v1871_v0 }
 0x177   :  { %1354 = vmatpush3.bf16.msra.mxu0 %v1408_v24  ;;  %v525_v24 = vrot.slane %v330_v6, %v2282_v56 }
 0x178   :  { %1355 = vmatprep.subr.bf16.mxu0 %v1871_v0 }
 0x17b   :  { %1356 = vmatpush3.bf16.msra.mxu0 %v1410_v26 }
 0x231   :  { %v436_v29 = vpop.f32.mrb[0].mxu0 }
 0x232   :  { %v437_v30 = vadd.f32 %v1241_v27, %v436_v29  ;;  %v1319_v31 = vpop.f32.mrb[1].mxu0 }
 0x233   :  { %v439_v32 = vpop.f32.mrb[2].mxu0 }
 0x234   :  { %v448_v33 = vsub.f32 %v437_v30, %v1250_v28  ;;  %v1320_v34 = vpop.f32.mrb[3].mxu0  ;;  %v539_v30 = vrot.slane %v326_v21, %v2271_v46  ;;  %v2300_v32 = vsub.s32 6, %v2268_v45 }
 0x236   :  { %v449_v35 = vfloor.f32 %v448_v33 }
 0x238   :  { %v451_v36 = vmul.f32 0.5, %v449_v35  ;;  %v450_v37 = vsub.f32 %v448_v33, %v449_v35  ;;  %v459_v40 = vadd.f32 1.0, %v449_v35 }
 0x23a   :  { %v452_v38 = vfloor.f32 %v451_v36  ;;  %vm456_vm2 = vcmp.eq.f32.partialorder %v450_v37, 0.5  ;;  %vm455_vm3 = vcmp.gt.f32.partialorder %v450_v37, 0.5 }
 0x23c   :  { %v453_v39 = vsub.f32 %v451_v36, %v452_v38  ;;  %v571_v36 = vrot.slane %v318_v14, %v2296_v25 }
 0x23e   :  { %vm454_vm1 = vcmp.ne.f32.partialorder %v453_v39, 0.0 }
 0x23f   :  { %vm457_vm4 = vmand %vm456_vm2, %vm454_vm1  ;;  %vm340_vm1 = vcmp.lt.s32.totalorder %v2268_v45, 2 }
 0x240   :  { %vm458_vm5 = vmor %vm455_vm3, %vm457_vm4 }
 0x241   :  { %v460_v41 = vsel %vm458_vm5, %v459_v40, %v449_v35  ;;  %v545_v35 = vrot.slane %v318_v14, %v2278_v52  ;;  %v2305_v40 = vsub.s32 4, %v2268_v45  ;;  %vm1218_vm5 = vcmp.eq.s32.totalorder %v2268_v45, 0 }
 0x242   :  { %v461_v42 = vadd.f32 %v1250_v28, %v460_v41 }
 0x244   :  { %v933_v43 = vpack.c.bf16 %v461_v42, %v461_v42  ;;  %v1251_v48 = vadd.f32 -0.5, %v461_v42  ;;  %v463_v50 = vadd.f32 0.5, %v461_v42  ;;  %v553_v42 = vrot.slane %v318_v14, %v2282_v56 }
 0x246   :  { %1338 = vmatmul.mubr.bf16.vlgmr.msra.gmra.mrb[0].mxu1 %v933_v43  ;;  %1358 = vmatmul.mubr.bf16.vlgmr.msra.gmra.mrb[4].mxu0 %v933_v43  ;;  %v468_v53 = vmul.f32 %v1251_v48, %v467_v49  ;;  %v469_v55 = vmul.f32 %v467_v49, %v463_v50  ;;  %v490_v60 = vmul.f32 %v1251_v48, %v489_v57 }
 0x247   :  { %v491_v63 = vmul.f32 %v489_v57, %v463_v50  ;;  %v512_v2 = vmul.f32 %v1251_v48, %v511_v62  ;;  %v513_v5 = vmul.f32 %v511_v62, %v463_v50  ;;  %v609_v43 = vrot.slane %v318_v14, %v2300_v32 }
 0x248   :  { %v474_v58 = vadd.f32 %v473_v54, %v468_v53  ;;  %v475_v59 = vadd.f32 %v473_v54, %v469_v55  ;;  %v496_v1 = vadd.f32 %v495_v61, %v490_v60  ;;  %v577_v50 = vrot.slane %v326_v21, %v2278_v52 }
 0x249   :  { %v497_v4 = vadd.f32 %v495_v61, %v491_v63  ;;  %v518_v7 = vadd.f32 %v517_v3, %v512_v2  ;;  %v519_v8 = vadd.f32 %v517_v3, %v513_v5  ;;  %v583_v57 = vrot.slane %v318_v14, %v2305_v40 }
 0x24a   :  { %1411 = vtanh.f32 %v474_v58 }
 0x24b   :  { %1413 = vtanh.f32 %v475_v59 }
 0x24c   :  { %1415 = vtanh.f32 %v496_v1 }
 0x24d   :  { %1417 = vtanh.f32 %v497_v4 }
 0x24e   :  { %1419 = vtanh.f32 %v518_v7 }
 0x24f   :  { %1421 = vtanh.f32 %v519_v8 }
 0x254   :  { %v1412_v10 = vpop.eup %1411 }
 0x255   :  { %v1414_v11 = vpop.eup %1413  ;;  %v482_v13 = vmul.f32 %v1412_v10, %v481_v9 }
 0x256   :  { %v483_v15 = vmul.f32 %v1414_v11, %v481_v9  ;;  %v1416_v17 = vpop.eup %1415 }
 0x257   :  { %v1418_v18 = vpop.eup %1417  ;;  %v484_v19 = vadd.f32 %v482_v13, %v474_v58  ;;  %v504_v23 = vmul.f32 %v1416_v17, %v503_v16  ;;  %v2312_v58 = vsub.s32 5, %v2268_v45 }
 0x258   :  { %v485_v22 = vadd.f32 %v483_v15, %v475_v59  ;;  %v1420_v26 = vpop.eup %1419  ;;  %v505_v27 = vmul.f32 %v1418_v18, %v503_v16  ;;  %v2315_v59 = vsub.s32 7, %v2268_v45 }
 0x259   :  { %v1422_v28 = vpop.eup %1421  ;;  %v534_v29 = vmul.f32 %v533_v20, %v484_v19  ;;  %v506_v33 = vadd.f32 %v504_v23, %v496_v1  ;;  %v526_v34 = vmul.f32 %v1420_v26, %v525_v24  ;;  %v572_v49 = vmul.f32 %v571_v36, %v484_v19 }
 0x25a   :  { %v535_v31 = vmul.f32 %v533_v20, %v485_v22  ;;  %v507_v37 = vadd.f32 %v505_v27, %v497_v4  ;;  %v527_v38 = vmul.f32 %v1422_v28, %v525_v24  ;;  %v573_v54 = vmul.f32 %v571_v36, %v485_v22  ;;  %v331_v28 = vld [vmem:[#allocation22] sm:$0x7]  ;;  %v320_v36 = vld [vmem:[#allocation9] sm:$0xff] }
 0x25b   :  { %v540_v39 = vadd.f32 %v539_v30, %v534_v29  ;;  %v528_v47 = vadd.f32 %v526_v34, %v518_v7  ;;  %v546_v48 = vmul.f32 %v545_v35, %v506_v33  ;;  %v578_v62 = vadd.f32 %v577_v50, %v572_v49 }
 0x25c   :  { %v541_v41 = vadd.f32 %v539_v30, %v535_v31  ;;  %v529_v51 = vadd.f32 %v527_v38, %v519_v8  ;;  %v547_v53 = vmul.f32 %v545_v35, %v507_v37  ;;  %v610_v63 = vmul.f32 %v609_v43, %v484_v19  ;;  %v1252_v19 = vld [vmem:[%s2394_s9 + $0x8] ss:$0 sm:$0xff] }
 0x25d   :  { %v548_v55 = vadd.f32 %v546_v48, %v540_v39  ;;  %v554_v61 = vmul.f32 %v553_v42, %v528_v47  ;;  %v615_v1 = vrot.slane %v326_v21, %v2282_v56  ;;  %v579_v3 = vadd.f32 %v577_v50, %v573_v54 }
 0x25e   :  { %v549_v60 = vadd.f32 %v547_v53, %v541_v41  ;;  %v555_v2 = vmul.f32 %v553_v42, %v529_v51  ;;  %v611_v4 = vmul.f32 %v609_v43, %v485_v22  ;;  %v584_v6 = vmul.f32 %v583_v57, %v506_v33 }
 0x25f   :  { %v556_v5 = vadd.f32 %v554_v61, %v548_v55  ;;  %v591_v7 = vrot.slane %v318_v14, %v2312_v58  ;;  %v621_v8 = vrot.slane %v318_v14, %v2315_v59  ;;  %v585_v10 = vmul.f32 %v583_v57, %v507_v37 }
 0x260   :  { %v557_v9 = vadd.f32 %v555_v2, %v549_v60  ;;  %v586_v11 = vadd.f32 %v584_v6, %v578_v62  ;;  %v616_v13 = vadd.f32 %v615_v1, %v610_v63  ;;  %v617_v16 = vadd.f32 %v615_v1, %v611_v4 }
 0x261   :  { %v587_v15 = vadd.f32 %v585_v10, %v579_v3  ;;  %1423 = vtanh.f32 %v556_v5  ;;  %v592_v17 = vmul.f32 %v591_v7, %v528_v47  ;;  %v622_v18 = vmul.f32 %v621_v8, %v506_v33 }
 0x262   :  { %1425 = vtanh.f32 %v557_v9  ;;  %v593_v20 = vmul.f32 %v591_v7, %v529_v51  ;;  %v623_v21 = vmul.f32 %v621_v8, %v507_v37  ;;  %v630_v26 = vmul.f32 %v1252_v19, %v528_v47  ;;  %v327_v47 = vld [vmem:[#allocation16] sm:$0x7] }
 0x263   :  { %v594_v22 = vadd.f32 %v592_v17, %v586_v11  ;;  %v624_v23 = vadd.f32 %v622_v18, %v616_v13  ;;  %v631_v27 = vmul.f32 %v1252_v19, %v529_v51  ;;  %v563_v31 = vrot.slane %v331_v28, %v2271_v46 }
 0x264   :  { %v595_v24 = vadd.f32 %v593_v20, %v587_v15  ;;  %v625_v14 = vadd.f32 %v623_v21, %v617_v16  ;;  %v601_v38 = vrot.slane %v331_v28, %v2278_v52  ;;  %v647_v43 = vrot.slane %v320_v36, %v2271_v46 }
 0x265   :  { %1427 = vtanh.f32 %v594_v22  ;;  %v632_v29 = vadd.f32 %v630_v26, %v624_v23  ;;  %v639_v50 = vrot.slane %v331_v28, %v2282_v56  ;;  %v653_v57 = vrot.slane %v327_v47, %v2271_v46 }
 0x266   :  { %1429 = vtanh.f32 %v595_v24  ;;  %v633_v30 = vadd.f32 %v631_v27, %v625_v14  ;;  %v659_v63 = vrot.slane %v320_v36, %v2278_v52  ;;  %v685_v1 = vrot.slane %v320_v36, %v2296_v25 }
 0x267   :  { %1431 = vtanh.f32 %v632_v29  ;;  %v667_v6 = vrot.slane %v320_v36, %v2282_v56  ;;  %v723_v7 = vrot.slane %v320_v36, %v2300_v32  ;;  %v691_v11 = vrot.slane %v327_v47, %v2278_v52 }
 0x268   :  { %1433 = vtanh.f32 %v633_v30  ;;  %v697_v18 = vrot.slane %v320_v36, %v2305_v40  ;;  %v729_v23 = vrot.slane %v327_v47, %v2282_v56 }
 0x26b   :  { %v1424_v33 = vpop.eup %1423 }
 0x26c   :  { %v1426_v34 = vpop.eup %1425  ;;  %v564_v35 = vmul.f32 %v1424_v33, %v563_v31 }
 0x26d   :  { %v565_v37 = vmul.f32 %v1426_v34, %v563_v31 }
 0x26e   :  { %v566_v42 = vadd.f32 %v564_v35, %v556_v5 }
 0x26f   :  { %v1428_v39 = vpop.eup %1427  ;;  %v567_v48 = vadd.f32 %v565_v37, %v557_v9 }
 0x270   :  { %v1430_v41 = vpop.eup %1429  ;;  %v602_v49 = vmul.f32 %v1428_v39, %v601_v38  ;;  %v648_v55 = vmul.f32 %v647_v43, %v566_v42  ;;  %v686_v10 = vmul.f32 %v685_v1, %v566_v42 }
 0x271   :  { %v1432_v51 = vpop.eup %1431  ;;  %v603_v53 = vmul.f32 %v1430_v41, %v601_v38  ;;  %v649_v60 = vmul.f32 %v647_v43, %v567_v48  ;;  %v687_v16 = vmul.f32 %v685_v1, %v567_v48  ;;  %v725_v26 = vmul.f32 %v723_v7, %v567_v48  ;;  %v322_v1 = vld [vmem:[#allocation10] sm:$0xff] }
 0x272   :  { %v1434_v54 = vpop.eup %1433  ;;  %v604_v61 = vadd.f32 %v602_v49, %v594_v22  ;;  %v640_v62 = vmul.f32 %v1432_v51, %v639_v50  ;;  %v654_v4 = vadd.f32 %v653_v57, %v648_v55  ;;  %v692_v21 = vadd.f32 %v691_v11, %v686_v10 }
 0x273   :  { %v605_v2 = vadd.f32 %v603_v53, %v595_v24  ;;  %v641_v3 = vmul.f32 %v1434_v54, %v639_v50  ;;  %v655_v5 = vadd.f32 %v653_v57, %v649_v60  ;;  %v724_v22 = vmul.f32 %v723_v7, %v566_v42  ;;  %v1253_v42 = vld [vmem:[#allocation9 + $0x8] ss:$0 sm:$0xff] }
 0x274   :  { %v642_v8 = vadd.f32 %v640_v62, %v632_v29  ;;  %v660_v9 = vmul.f32 %v659_v63, %v604_v61  ;;  %v693_v14 = vadd.f32 %v691_v11, %v687_v16  ;;  %v698_v28 = vmul.f32 %v697_v18, %v604_v61 }
 0x275   :  { %v643_v13 = vadd.f32 %v641_v3, %v633_v30  ;;  %v661_v15 = vmul.f32 %v659_v63, %v605_v2  ;;  %v705_v29 = vrot.slane %v320_v36, %v2312_v58  ;;  %v735_v30 = vrot.slane %v320_v36, %v2315_v59  ;;  %v332_v36 = vld [vmem:[#allocation24] sm:$0x7] }
 0x276   :  { %v662_v17 = vadd.f32 %v660_v9, %v654_v4  ;;  %v668_v20 = vmul.f32 %v667_v6, %v642_v8  ;;  %v699_v33 = vmul.f32 %v697_v18, %v605_v2  ;;  %v700_v34 = vadd.f32 %v698_v28, %v692_v21 }
 0x277   :  { %v663_v19 = vadd.f32 %v661_v15, %v655_v5  ;;  %v669_v24 = vmul.f32 %v667_v6, %v643_v13  ;;  %v730_v35 = vadd.f32 %v729_v23, %v724_v22  ;;  %v731_v38 = vadd.f32 %v729_v23, %v725_v26 }
 0x278   :  { %v670_v27 = vadd.f32 %v668_v20, %v662_v17  ;;  %v701_v37 = vadd.f32 %v699_v33, %v693_v14  ;;  %v706_v39 = vmul.f32 %v705_v29, %v642_v8  ;;  %v736_v41 = vmul.f32 %v735_v30, %v604_v61 }
 0x279   :  { %v671_v31 = vadd.f32 %v669_v24, %v663_v19  ;;  %v707_v43 = vmul.f32 %v705_v29, %v643_v13  ;;  %v737_v47 = vmul.f32 %v735_v30, %v605_v2  ;;  %v744_v53 = vmul.f32 %v1253_v42, %v642_v8  ;;  %v328_v8 = vld [vmem:[#allocation18] sm:$0x7] }
 0x27a   :  { %1435 = vtanh.f32 %v670_v27  ;;  %v708_v48 = vadd.f32 %v706_v39, %v700_v34  ;;  %v738_v49 = vadd.f32 %v736_v41, %v730_v35  ;;  %v745_v54 = vmul.f32 %v1253_v42, %v643_v13 }
 0x27b   :  { %1437 = vtanh.f32 %v671_v31  ;;  %v709_v50 = vadd.f32 %v707_v43, %v701_v37  ;;  %v739_v51 = vadd.f32 %v737_v47, %v731_v38  ;;  %v677_v60 = vrot.slane %v332_v36, %v2271_v46 }
 0x27c   :  { %1439 = vtanh.f32 %v708_v48  ;;  %v746_v55 = vadd.f32 %v744_v53, %v738_v49  ;;  %v715_v3 = vrot.slane %v332_v36, %v2278_v52  ;;  %v761_v7 = vrot.slane %v322_v1, %v2271_v46 }
 0x27d   :  { %1441 = vtanh.f32 %v709_v50  ;;  %v747_v57 = vadd.f32 %v745_v54, %v739_v51  ;;  %v753_v11 = vrot.slane %v332_v36, %v2282_v56  ;;  %v767_v18 = vrot.slane %v328_v8, %v2271_v46 }
 0x27e   :  { %1443 = vtanh.f32 %v746_v55  ;;  %v773_v22 = vrot.slane %v322_v1, %v2278_v52  ;;  %v799_v23 = vrot.slane %v322_v1, %v2296_v25  ;;  %v781_v28 = vrot.slane %v322_v1, %v2282_v56 }
 0x27f   :  { %1445 = vtanh.f32 %v747_v57  ;;  %v837_v29 = vrot.slane %v322_v1, %v2300_v32  ;;  %v805_v34 = vrot.slane %v328_v8, %v2278_v52  ;;  %v811_v41 = vrot.slane %v322_v1, %v2305_v40 }
 0x280   :  { %v819_v54 = vrot.slane %v322_v1, %v2312_v58  ;;  %v849_v36 = vrot.slane %v322_v1, %v2315_v59  ;;  %v333_v1 = vld [vmem:[#allocation25] sm:$0x7] }
 0x284   :  { %v1436_v62 = vpop.eup %1435 }
 0x285   :  { %v1438_v61 = vpop.eup %1437  ;;  %v678_v63 = vmul.f32 %v1436_v62, %v677_v60 }
 0x286   :  { %v679_v2 = vmul.f32 %v1438_v61, %v677_v60  ;;  %v1440_v4 = vpop.eup %1439 }
 0x287   :  { %v1442_v5 = vpop.eup %1441  ;;  %v680_v6 = vadd.f32 %v678_v63, %v670_v27  ;;  %v716_v10 = vmul.f32 %v1440_v4, %v715_v3 }
 0x288   :  { %v681_v9 = vadd.f32 %v679_v2, %v671_v31  ;;  %v1444_v13 = vpop.eup %1443  ;;  %v717_v15 = vmul.f32 %v1442_v5, %v715_v3  ;;  %v1254_v3 = vld [vmem:[#allocation10 + $0x8] ss:$0 sm:$0xff] }
 0x289   :  { %v1446_v16 = vpop.eup %1445  ;;  %v762_v17 = vmul.f32 %v761_v7, %v680_v6  ;;  %v718_v20 = vadd.f32 %v716_v10, %v708_v48  ;;  %v754_v21 = vmul.f32 %v1444_v13, %v753_v11  ;;  %v800_v33 = vmul.f32 %v799_v23, %v680_v6 }
 0x28a   :  { %v763_v19 = vmul.f32 %v761_v7, %v681_v9  ;;  %v719_v24 = vadd.f32 %v717_v15, %v709_v50  ;;  %v755_v14 = vmul.f32 %v1446_v16, %v753_v11  ;;  %v801_v38 = vmul.f32 %v799_v23, %v681_v9 }
 0x28b   :  { %v768_v26 = vadd.f32 %v767_v18, %v762_v17  ;;  %v756_v30 = vadd.f32 %v754_v21, %v746_v55  ;;  %v774_v31 = vmul.f32 %v773_v22, %v718_v20  ;;  %v806_v43 = vadd.f32 %v805_v34, %v800_v33 }
 0x28c   :  { %v769_v27 = vadd.f32 %v767_v18, %v763_v19  ;;  %v757_v35 = vadd.f32 %v755_v14, %v747_v57  ;;  %v775_v37 = vmul.f32 %v773_v22, %v719_v24  ;;  %v838_v47 = vmul.f32 %v837_v29, %v680_v6  ;;  %v324_v19 = vld [vmem:[#allocation12] sm:$0x7] }
 0x28d   :  { %v776_v39 = vadd.f32 %v774_v31, %v768_v26  ;;  %v782_v42 = vmul.f32 %v781_v28, %v756_v30  ;;  %v843_v48 = vrot.slane %v328_v8, %v2282_v56  ;;  %v807_v50 = vadd.f32 %v805_v34, %v801_v38  ;;  %v1255_v34 = vld [vmem:[#allocation19] ss:$0 sm:$0xff] }
 0x28e   :  { %v777_v25 = vadd.f32 %v775_v37, %v769_v27  ;;  %v783_v49 = vmul.f32 %v781_v28, %v757_v35  ;;  %v839_v32 = vmul.f32 %v837_v29, %v681_v9  ;;  %v812_v53 = vmul.f32 %v811_v41, %v718_v20 }
 0x28f   :  { %v784_v51 = vadd.f32 %v782_v42, %v776_v39  ;;  %v813_v57 = vmul.f32 %v811_v41, %v719_v24  ;;  %v844_v62 = vadd.f32 %v843_v48, %v838_v47  ;;  %v820_v63 = vmul.f32 %v819_v54, %v756_v30 }
 0x290   :  { %v785_v55 = vadd.f32 %v783_v49, %v777_v25  ;;  %v814_v60 = vadd.f32 %v812_v53, %v806_v43  ;;  %v845_v61 = vadd.f32 %v843_v48, %v839_v32  ;;  %v850_v2 = vmul.f32 %v849_v36, %v718_v20 }
 0x291   :  { %v815_v40 = vadd.f32 %v813_v57, %v807_v50  ;;  %1447 = vtanh.f32 %v784_v51  ;;  %v821_v4 = vmul.f32 %v819_v54, %v757_v35  ;;  %v851_v5 = vmul.f32 %v849_v36, %v719_v24 }
 0x292   :  { %1449 = vtanh.f32 %v785_v55  ;;  %v822_v6 = vadd.f32 %v820_v63, %v814_v60  ;;  %v852_v7 = vadd.f32 %v850_v2, %v844_v62  ;;  %v858_v58 = vmul.f32 %v1254_v3, %v756_v30  ;;  %v1256_v62 = vld [vmem:[#allocation4] ss:$0 sm:$0xff] }
 0x293   :  { %v823_v8 = vadd.f32 %v821_v4, %v815_v40  ;;  %v853_v9 = vadd.f32 %v851_v5, %v845_v61  ;;  %v859_v10 = vmul.f32 %v1254_v3, %v757_v35  ;;  %v791_v15 = vrot.slane %v333_v1, %v2271_v46  ;;  %v1265_v40 = vld [vmem:[#allocation7] ss:$0 sm:$0xff] }
 0x294   :  { %1451 = vtanh.f32 %v822_v6  ;;  %v860_v59 = vadd.f32 %v858_v58, %v852_v7  ;;  %v829_v21 = vrot.slane %v333_v1, %v2278_v52  ;;  %v875_v14 = vrot.slane %v324_v19, %v2271_v46 }
 0x295   :  { %1453 = vtanh.f32 %v823_v8  ;;  %v861_v11 = vadd.f32 %v859_v10, %v853_v9  ;;  %v867_v29 = vrot.slane %v333_v1, %v2282_v56  ;;  %v889_v35 = vrot.slane %v324_v19, %v2278_v52 }
 0x296   :  { %1455 = vtanh.f32 %v860_v59  ;;  %v897_v43 = vrot.slane %v324_v19, %v2282_v56 }
 0x297   :  { %1457 = vtanh.f32 %v861_v11 }
 0x29b   :  { %v1448_v13 = vpop.eup %1447 }
 0x29c   :  { %v1450_v16 = vpop.eup %1449  ;;  %v792_v17 = vmul.f32 %v1448_v13, %v791_v15 }
 0x29d   :  { %v793_v18 = vmul.f32 %v1450_v16, %v791_v15 }
 0x29e   :  { %v1452_v20 = vpop.eup %1451  ;;  %v794_v23 = vadd.f32 %v792_v17, %v784_v51 }
 0x29f   :  { %v1454_v22 = vpop.eup %1453  ;;  %v795_v24 = vadd.f32 %v793_v18, %v785_v55  ;;  %v830_v27 = vmul.f32 %v1452_v20, %v829_v21 }
 0x2a0   :  { %v1456_v26 = vpop.eup %1455  ;;  %v831_v28 = vmul.f32 %v1454_v22, %v829_v21  ;;  %v876_v31 = vmul.f32 %v875_v14, %v794_v23 }
 0x2a1   :  { %v1458_v30 = vpop.eup %1457  ;;  %v877_v33 = vmul.f32 %v875_v14, %v795_v24  ;;  %v832_v37 = vadd.f32 %v830_v27, %v822_v6  ;;  %v868_v39 = vmul.f32 %v1456_v26, %v867_v29 }
 0x2a2   :  { %v833_v38 = vadd.f32 %v831_v28, %v823_v8  ;;  %v869_v41 = vmul.f32 %v1458_v30, %v867_v29  ;;  %v884_v25 = vadd.f32 %v1255_v34, %v876_v31 }
 0x2a3   :  { %v885_v42 = vadd.f32 %v1255_v34, %v877_v33  ;;  %v870_v46 = vadd.f32 %v868_v39, %v860_v59  ;;  %v890_v48 = vmul.f32 %v889_v35, %v832_v37 }
 0x2a4   :  { %v871_v47 = vadd.f32 %v869_v41, %v861_v11  ;;  %v891_v49 = vmul.f32 %v889_v35, %v833_v38 }
 0x2a5   :  { %v892_v50 = vadd.f32 %v890_v48, %v884_v25  ;;  %v898_v51 = vmul.f32 %v897_v43, %v870_v46 }
 0x2a6   :  { %v893_v32 = vadd.f32 %v891_v49, %v885_v42  ;;  %v899_v53 = vmul.f32 %v897_v43, %v871_v47 }
 0x2a7   :  { %v900_v54 = vadd.f32 %v898_v51, %v892_v50 }
 0x2a8   :  { %v901_v36 = vadd.f32 %v899_v53, %v893_v32 }
 0x2aa   :  { %v902_v55 = vadd.f32 %v901_v36, %v900_v54 }
 0x2ac   :  { %vm904_vm6 = vcmp.lt.f32.partialorder %v902_v55, 0.0  ;;  %vm903_vm7 = vcmp.gt.f32.partialorder %v902_v55, 0.0 }
 0x2ad   :  { %v905_v52 = vsel %vm904_vm6, -1.0, %v1871_v0 }
 0x2ae   :  { %v906_v57 = vsel %vm903_vm7, 1.0, %v905_v52 }
 0x2af   :  { %v907_v60 = vsub.f32 0.0, %v906_v57 }
 0x2b1   :  { %v2358_v5 = vmul.f32 %v907_v60, %v901_v36  ;;  %v2360_v8 = vmul.f32 %v907_v60, %v900_v54 }
 0x2b3   :  { %v909_v11 = vand.u32 2147483647, %v2358_v5  ;;  %v920_v16 = vand.u32 2147483647, %v2360_v8  ;;  %vm916_vm11 = vcmp.ge.f32.partialorder %v2358_v5, 0.0  ;;  %vm927_vm12 = vcmp.ge.f32.partialorder %v2360_v8, 0.0 }
 0x2b5   :  { %v910_v18 = vsub.f32 0.0, %v909_v11  ;;  %v921_v19 = vsub.f32 0.0, %v920_v16 }
 0x2b7   :  { %v911_v21 = vmul.f32 1.442695, %v910_v18  ;;  %v922_v22 = vmul.f32 1.442695, %v921_v19 }
 0x319   :  { %v1022_v56 = vpop.f32.mrb[0].mxu1  ;;  %v1119_v61 = vpop.f32.mrb[4].mxu0 }
 0x31a   :  { %v1023_v63 = vadd.f32 %v1256_v62, %v1022_v56  ;;  %v1120_v2 = vadd.f32 %v1265_v40, %v1119_v61  ;;  %v1339_v3 = vpop.f32.mrb[1].mxu1  ;;  %v1359_v4 = vpop.f32.mrb[5].mxu0 }
 0x31b   :  { %v1025_v6 = vpop.f32.mrb[2].mxu1  ;;  %v1122_v7 = vpop.f32.mrb[6].mxu0 }
 0x31c   :  { %vm1028_vm8 = vcmp.ge.f32.partialorder %v1023_v63, 0.0  ;;  %v1029_v9 = vmul.f32 0.01, %v1023_v63  ;;  %vm1125_vm9 = vcmp.ge.f32.partialorder %v1120_v2, 0.0  ;;  %v1126_v58 = vmul.f32 0.01, %v1120_v2 }
 0x31d   :  { %v1340_v10 = vpop.f32.mrb[3].mxu1  ;;  %v1360_v59 = vpop.f32.mrb[7].mxu0 }
 0x31e   :  { %v1127_v1 = vsel %vm1125_vm9, %v1120_v2, %v1126_v58  ;;  %v1030_v13 = vsel %vm1028_vm8, %v1023_v63, %v1029_v9 }
 0x31f   :  { %v1130_v15 = vmax.f32 %v1127_v1, 0.11  ;;  %v1128_v17 = vsub.f32 %v2242_v12, %v1030_v13 }
 0x321   :  { %1459 = vrcp.f32 %v1130_v15  ;;  %v1129_v20 = vand.u32 2147483647, %v1128_v17 }
 0x322   :  { %1461 = vpow2.f32 %v911_v21 }
 0x323   :  { %v1132_v23 = vsub.f32 0.5, %v1129_v20  ;;  %v1161_v24 = vsub.f32 -0.5, %v1129_v20  ;;  %1463 = vpow2.f32 %v922_v22 }
 0x32b   :  { %v1460_v14 = vpop.eup %1459 }
 0x32c   :  { %v1133_v26 = vmul.f32 %v1460_v14, %v1132_v23  ;;  %v1162_v27 = vmul.f32 %v1460_v14, %v1161_v24  ;;  %v1462_v34 = vpop.eup %1461 }
 0x32d   :  { %v1464_v37 = vpop.eup %1463  ;;  %v913_v39 = vadd.f32 1.0, %v1462_v34 }
 0x32e   :  { %v2365_v28 = vmul.f32 0.70710677, %v1133_v26  ;;  %v2367_v29 = vmul.f32 0.70710677, %v1162_v27  ;;  %v924_v41 = vadd.f32 1.0, %v1464_v37 }
 0x330   :  { %v1139_v30 = vand.u32 2147483647, %v2365_v28  ;;  %v1168_v12 = vand.u32 2147483647, %v2367_v29  ;;  %vm1136_vm10 = vcmp.lt.f32.partialorder %v2365_v28, 0.0  ;;  %vm1165_vm13 = vcmp.lt.f32.partialorder %v2367_v29, 0.0 }
 0x331   :  { %vm1135_vm14 = vcmp.gt.f32.partialorder %v2365_v28, 0.0  ;;  %v1137_v17 = vsel %vm1136_vm10, -1.0, %v1871_v0  ;;  %vm1164_vm15 = vcmp.gt.f32.partialorder %v2367_v29, 0.0  ;;  %v1166_v19 = vsel %vm1165_vm13, -1.0, %v1871_v0 }
 0x332   :  { %v1140_v31 = vmul.f32 0.3275911, %v1139_v30  ;;  %v1169_v33 = vmul.f32 0.3275911, %v1168_v12  ;;  %v1152_v25 = vsub.f32 0.0, %v1139_v30  ;;  %v1181_v42 = vsub.f32 0.0, %v1168_v12 }
 0x333   :  { %v1138_v21 = vsel %vm1135_vm14, 1.0, %v1137_v17  ;;  %v1167_v24 = vsel %vm1164_vm15, 1.0, %v1166_v19  ;;  %v342_v0 = vand.u32 127, %v336_v44 }
 0x334   :  { %v1141_v35 = vadd.f32 1.0, %v1140_v31  ;;  %v1170_v38 = vadd.f32 1.0, %v1169_v33  ;;  %v1153_v46 = vmul.f32 %v1152_v25, %v1139_v30  ;;  %v1182_v49 = vmul.f32 %v1181_v42, %v1168_v12 }
 0x335   :  { %vm343_vm0 = vcmp.lt.s32.totalorder %v342_v0, 8  ;;  %vm345_vm3 = vcmp.lt.s32.totalorder %v342_v0, 16  ;;  %vm1221_vm6 = vcmp.eq.s32.totalorder %v342_v0, 1  ;;  %vm1219_vm7 = vcmp.eq.s32.totalorder %v342_v0, 0 }
 0x336   :  { %1465 = vrcp.f32 %v1141_v35  ;;  %v1154_v51 = vmul.f32 1.442695, %v1153_v46  ;;  %v1183_v55 = vmul.f32 1.442695, %v1182_v49  ;;  %vm344_vm2 = vmand %vm340_vm1, %vm343_vm0 }
 0x337   :  { %1467 = vrcp.f32 %v1170_v38  ;;  %vm346_vm4 = vmand %vm340_vm1, %vm345_vm3 }
 0x338   :  { %1469 = vrcp.f32 %v913_v39  ;;  %vm1222_vm8 = vmand %vm1218_vm5, %vm1221_vm6 }
 0x339   :  { %1471 = vrcp.f32 %v924_v41  ;;  %vm1220_vm9 = vmand %vm1218_vm5, %vm1219_vm7 }
 0x33a   :  { %1473 = vpow2.f32 %v1154_v51 }
 0x33b   :  { %1475 = vpow2.f32 %v1183_v55 }
 0x340   :  { %v1466_v43 = vpop.eup %1465 }
 0x341   :  { %v1468_v47 = vpop.eup %1467  ;;  %v1143_v48 = vmul.f32 1.0614054, %v1466_v43 }
 0x342   :  { %v1172_v50 = vmul.f32 1.0614054, %v1468_v47  ;;  %v1470_v54 = vpop.eup %1469 }
 0x343   :  { %v1144_v32 = vadd.f32 -1.4531521, %v1143_v48  ;;  %v1472_v52 = vpop.eup %1471  ;;  %v915_v56 = vmul.f32 %v1470_v54, %v1462_v34 }
 0x344   :  { %v1173_v53 = vadd.f32 -1.4531521, %v1172_v50  ;;  %v926_v61 = vmul.f32 %v1472_v52, %v1464_v37  ;;  %v1474_v13 = vpop.eup %1473 }
 0x345   :  { %v1145_v36 = vmul.f32 %v1466_v43, %v1144_v32  ;;  %v917_v6 = vsub.f32 1.0, %v915_v56  ;;  %v1476_v16 = vpop.eup %1475 }
 0x346   :  { %v1174_v57 = vmul.f32 %v1468_v47, %v1173_v53  ;;  %v928_v7 = vsub.f32 1.0, %v926_v61 }
 0x347   :  { %v1146_v60 = vadd.f32 1.4214138, %v1145_v36  ;;  %v918_v1 = vsel %vm916_vm11, %v917_v6, %v915_v56 }
 0x348   :  { %v1175_v62 = vadd.f32 1.4214138, %v1174_v57  ;;  %v929_v11 = vsel %vm927_vm12, %v928_v7, %v926_v61 }
 0x349   :  { %v1147_v40 = vmul.f32 %v1466_v43, %v1146_v60  ;;  %v930_v20 = vsub.f32 %v918_v1, %v929_v11 }
 0x34a   :  { %v1176_v63 = vmul.f32 %v1468_v47, %v1175_v62 }
 0x34b   :  { %v1148_v2 = vadd.f32 -0.28449672, %v1147_v40  ;;  %v931_v26 = vand.u32 2147483647, %v930_v20 }
 0x34c   :  { %v1177_v3 = vadd.f32 -0.28449672, %v1176_v63 }
 0x34d   :  { %v1149_v4 = vmul.f32 %v1466_v43, %v1148_v2  ;;  %v932_v31 = vmax.f32 %v931_v26, 1e-09 }
 0x34e   :  { %v1178_v9 = vmul.f32 %v1468_v47, %v1177_v3 }
 0x34f   :  { %v1150_v58 = vadd.f32 0.2548296, %v1149_v4  ;;  %1477 = vlog2.f32 %v932_v31 }
 0x350   :  { %v1179_v10 = vadd.f32 0.2548296, %v1178_v9 }
 0x351   :  { %v1151_v59 = vmul.f32 %v1466_v43, %v1150_v58 }
 0x352   :  { %v1180_v15 = vmul.f32 %v1468_v47, %v1179_v10 }
 0x353   :  { %v1156_v18 = vmul.f32 %v1474_v13, %v1151_v59 }
 0x354   :  { %v1185_v5 = vmul.f32 %v1476_v16, %v1180_v15 }
 0x355   :  { %v1157_v8 = vsub.f32 1.0, %v1156_v18 }
 0x356   :  { %v1186_v22 = vsub.f32 1.0, %v1185_v5 }
 0x357   :  { %v1158_v23 = vmul.f32 %v1157_v8, %v1138_v21 }
 0x358   :  { %v1187_v14 = vmul.f32 %v1186_v22, %v1167_v24 }
 0x359   :  { %v1159_v27 = vadd.f32 1.0, %v1158_v23  ;;  %v1478_v29 = vpop.eup %1477 }
 0x35a   :  { %v1188_v30 = vadd.f32 1.0, %v1187_v14  ;;  %v1206_v38 = vmul.f32 0.6931472, %v1478_v29 }
 0x35b   :  { %v1160_v12 = vmul.f32 0.5, %v1159_v27 }
 0x35c   :  { %v1189_v28 = vmul.f32 0.5, %v1188_v30  ;;  %v1207_v25 = vsub.f32 0.0, %v1206_v38 }
 0x35e   :  { %v1190_v33 = vsub.f32 %v1160_v12, %v1189_v28  ;;  %v1208_v42 = vsel %vm346_vm4, %v1207_v25, 0.0 }
 0x360   :  { %v1191_v34 = vmax.f32 %v1190_v33, 1e-09 }
 0x362   :  { %1479 = vlog2.f32 %v1191_v34 }
 0x36c   :  { %v1480_v35 = vpop.eup %1479 }
 0x36d   :  { %v1193_v37 = vmul.f32 0.6931472, %v1480_v35 }
 0x36f   :  { %v1194_v39 = vsub.f32 0.0, %v1193_v37 }
 0x371   :  { %v1195_v41 = vsel %vm344_vm2, %v1194_v39, 0.0 }
 0x372   :  { %1196 = vadd.xlane.f32.xlu0 %v1195_v41 }
 0x376   :  { %1209 = vadd.xlane.f32.xlu0 %v1208_v42 }
 0x3ff   :  { %v1197_v43 = vpop.xlane.xlu0 %1196 }
 0x400   :  { %v1198_v46 = vrot.slane %v1197_v43, 4 }
 0x402   :  { %v1199_v47 = vadd.f32 %v1198_v46, %v1197_v43 }
 0x403   :  { %v1210_v44 = vpop.xlane.xlu0 %1209 }
 0x404   :  { %v1200_v48 = vrot.slane %v1199_v47, 2  ;;  %v1211_v49 = vrot.slane %v1210_v44, 4 }
 0x406   :  { %v1212_v50 = vadd.f32 %v1211_v49, %v1210_v44  ;;  %v1201_v32 = vadd.f32 %v1200_v48, %v1199_v47 }
 0x408   :  { %v1213_v51 = vrot.slane %v1212_v50, 2  ;;  %v1202_v53 = vrot.slane %v1201_v32, 1 }
 0x40a   :  { %v1214_v54 = vadd.f32 %v1213_v51, %v1212_v50  ;;  %v1203_v36 = vadd.f32 %v1202_v53, %v1201_v32 }
 0x40c   :  { %1361 = vpush %v1203_v36  ;;  %v1215_v55 = vrot.slane %v1214_v54, 1 }
 0x40e   :  { %v1216_v52 = vadd.f32 %v1215_v55, %v1214_v54 }
 0x410   :  { %1363 = vpush %v1216_v52 }
 0x43d   :  { %s1362_s9 = spop %1361 }
 0x43e   :  { %v1225_v60 = vstv %s1362_s9 }
 0x441   :  { %s1364_s12 = spop %1363 }
 0x442   :  { %v1223_v57 = vstv %s1364_s12 }
 0x443   :  { %v1224_v62 = vsel %vm1222_vm8, %v1223_v57, 0.0 }
 0x444   :  { %v1226_v40 = vsel %vm1220_vm9, %v1225_v60, %v1224_v62 }
 0x445   :  { %1227 = vst [vmem:[%s2407_s22] sm:$0xff] %v1226_v40 }
 0x446   :  { %1232 = vsyncpa [#allocation3], 1 }
 0x447   :  { %1233 = vsyncpa [#allocation5], 1 }
 0x448   :  { %1234 = vsyncpa [#allocation8], 1 }
 0x449   :  { %1235 = vsyncpa [#allocation11], 1 }
 0x44a   :  { %1236 = vsyncpa [#allocation14], 1 }
 0x44b   :  { %1237 = vsyncpa [#allocation17], 1 }
 0x44c   :  { %1238 = vsyncpa [#allocation20], 1 }
 0x44d   :  { %1239 = vsyncpa [#allocation23], 1 }
 0x44e   :  { %1240 = vsyncpa [#allocation26], 1 }

</bundles_post_ra>
